<compile_context>
chip_gen: v6e
topology: v6e:2x2x1
jax: 0.10.0
libtpu: 0.0.40
codegen_flags: <defaults>
</compile_context>

<pallas_src>
from functools import partial

import jax
import jax.numpy as jnp
from jax.experimental import pallas as pl
from jax.experimental.pallas import tpu as pltpu


def _layernorm_f32(x, w, b, eps=1e-5):
    # One-pass variance (E[x^2] - mu^2).  Slightly less robust than two-pass
    # for huge-magnitude activations, but fine at transformer scales.
    mu = jnp.mean(x, axis=-1, keepdims=True)
    ex2 = jnp.mean(x * x, axis=-1, keepdims=True)
    var = ex2 - mu * mu
    return (x - mu) * jax.lax.rsqrt(var + eps) * w + b


def heuristic_block_kernel(x_ref, mask_q_ref, mask_k_ref,
                           ln1_w_ref, ln1_b_ref,
                           wqkv_ref, wproj_ref, bproj_ref,
                           ln2_w_ref, ln2_b_ref,
                           wfc1_ref, bfc1_ref,
                           wfc2_ref, bfc2_ref,
                           out_ref, ctx_ref, *, num_heads):
    f32 = jnp.float32
    bf16 = jnp.bfloat16

    M, C = x_ref.shape
    TB, _, N = mask_k_ref.shape
    H = num_heads
    D = C // H

    x = x_ref[...]                                        # (M, C) f32, M = TB*N

    # ---- LayerNorm 1 (f32 statistics) ----
    xn = _layernorm_f32(x, ln1_w_ref[...], ln1_b_ref[...])

    # ---- fused QKV: one full-width (M,C)x(C,3C) bf16 matmul (f32 accum).
    #      Column order matches nn.Linear(dim, 3*dim) + reshape(..,3,H,D):
    #      [ q(h0..h_{H-1}) | k(...) | v(...) ]; q columns pre-scaled. ----
    qkv = jnp.dot(xn.astype(bf16), wqkv_ref[...], preferred_element_type=f32)
    q = qkv[:, 0 * C:1 * C]
    k = qkv[:, 1 * C:2 * C]
    v = qkv[:, 2 * C:3 * C]

    # ---- masked attention: static (fully unrolled) loops over the TB batch
    #      elements and H heads.  Each iteration ends with a store into the
    #      (M, C) VMEM scratch (head-major columns == the reference
    #      transpose(1,2).reshape(B,N,C) layout), so no concat and no (H,M,C)
    #      intermediate; live ranges are bounded by the scratch stores. ----
    for b in range(TB):
        r0 = b * N
        mq = mask_q_ref[r0:r0 + N, :]                     # (N, 1) query keep
        mk = mask_k_ref[b]                                # (1, N) key keep
        keep = mq * mk                                    # (N, N), 1 = attend
        bias = (keep - 1.0) * 1e30                        # 0 / -1e30 additive
        for h in range(H):
            c0 = h * D
            qh = q[r0:r0 + N, c0:c0 + D].astype(bf16)     # (N, D)
            kh = k[r0:r0 + N, c0:c0 + D].astype(bf16)
            vh = v[r0:r0 + N, c0:c0 + D].astype(bf16)
            # q @ k^T without an explicit transpose
            dots = jax.lax.dot_general(
                qh, kh, (((1,), (1,)), ((), ())),
                preferred_element_type=f32)               # (N, N) f32
            # exact masked_fill semantics (fully-masked rows -> uniform)
            dots = dots * keep + bias
            dots = dots - jnp.max(dots, axis=-1, keepdims=True)
            e = jnp.exp(dots)
            p = e * pl.reciprocal(jnp.sum(e, axis=-1, keepdims=True),
                                  approx=True)
            ctx_ref[r0:r0 + N, c0:c0 + D] = jnp.dot(
                p.astype(bf16), vh, preferred_element_type=f32)

    # ---- output projection: single full-width (M,C)x(C,C) matmul ----
    attn_out = jnp.dot(ctx_ref[...].astype(bf16), wproj_ref[...],
                       preferred_element_type=f32) + bproj_ref[...]
    x1 = x + attn_out

    # ---- LayerNorm 2 + MLP (Linear -> GELU(tanh) -> Linear) ----
    x2n = _layernorm_f32(x1, ln2_w_ref[...], ln2_b_ref[...]).astype(bf16)
    h1 = jnp.dot(x2n, wfc1_ref[...], preferred_element_type=f32) + bfc1_ref[...]
    g = jax.nn.gelu(h1, approximate=True)                 # tanh form -> EUP
    mlp = jnp.dot(g.astype(bf16), wfc2_ref[...],
                  preferred_element_type=f32) + bfc2_ref[...]

    out_ref[...] = x1 + mlp


def _choose_batch_tile(B, N, C, Hd, vmem_budget_bytes):
    """Largest divisor of B whose (TB*N)-row tile fits the VMEM budget.

    Keeps the grid length >= 2 when B >= 2 so both TensorCores of a v7x
    megacore get work under dimension_semantics=('parallel',), and caps the
    tile at ~1024 rows (enough to amortize per-step pipeline overhead).
    """
    weight_bytes = 2 * (3 * C * C + C * C + 2 * C * Hd)   # bf16 weights
    weight_bytes *= 2                                     # worst case: double-buffered

    def tile_bytes(tb):
        m = tb * N
        # in/out blocks (double-buffered), ctx scratch, qkv + residual /
        # normalized temporaries (f32) and the two M x Hd MLP intermediates.
        act = 4 * m * (11 * C + 2 * Hd)
        return act + weight_bytes

    max_tb = B if B == 1 else max(1, B // 2)
    max_tb = min(max_tb, max(1, 1024 // max(N, 1)))
    for tb in range(max_tb, 0, -1):
        if B % tb == 0 and tile_bytes(tb) <= vmem_budget_bytes:
            return tb
    return 1


def heuristic_block(x, mask, params, num_heads):
    B, N, C = x.shape
    H = num_heads
    D = C // H
    Hd = params['wfc1'].shape[1]
    f32, bf16 = jnp.float32, jnp.bfloat16

    # ---- per-generation VMEM budget / tile derivation ----
    try:
        vmem_cap = int(pltpu.get_tpu_info().vmem_capacity_bytes)
    except Exception:
        vmem_cap = 64 * 1024 * 1024            # conservative (v7x per-TC VMEM)
    budget = (vmem_cap * 55) // 100
    vmem_limit = max(32 * 1024 * 1024,
                     min((vmem_cap * 3) // 4, 96 * 1024 * 1024))

    TB = _choose_batch_tile(B, N, C, Hd, budget)
    grid = (B // TB,)
    M = TB * N

    # ---- wrapper-side (one-time, free) layout / dtype prep ----
    x2d = x.reshape(B * N, C).astype(f32)
    maskf = mask.astype(f32)
    mask_qry = maskf.reshape(B * N, 1)         # per-row (query) keep flag
    mask_key = maskf.reshape(B, 1, N)          # per-batch key keep row

    wqkv_f = params['wqkv'].astype(f32)
    wqkv_f = wqkv_f.at[:, :C].multiply(D ** -0.5)   # fold attention scale into q
    wqkv16 = wqkv_f.astype(bf16)
    wproj16 = params['wproj'].astype(bf16)
    wfc1_16 = params['wfc1'].astype(bf16)
    wfc2_16 = params['wfc2'].astype(bf16)

    operands = (x2d, mask_qry, mask_key,
                params['ln1_w'].astype(f32), params['ln1_b'].astype(f32),
                wqkv16, wproj16, params['bproj'].astype(f32),
                params['ln2_w'].astype(f32), params['ln2_b'].astype(f32),
                wfc1_16, params['bfc1'].astype(f32),
                wfc2_16, params['bfc2'].astype(f32))

    def run(single_buffer_weights):
        def wspec(shape):
            idx = lambda i, _s=shape: (0,) * len(_s)
            if single_buffer_weights:
                return pl.BlockSpec(shape, idx, pipeline_mode=pl.Buffered(1))
            return pl.BlockSpec(shape, idx)

        in_specs = [
            pl.BlockSpec((M, C), lambda i: (i, 0)),          # activations
            pl.BlockSpec((M, 1), lambda i: (i, 0)),          # query keep
            pl.BlockSpec((TB, 1, N), lambda i: (i, 0, 0)),   # key keep
            wspec((1, C)), wspec((1, C)),                    # ln1 w, b
            wspec((C, 3 * C)),                               # fused wqkv
            wspec((C, C)), wspec((1, C)),                    # wproj, bproj
            wspec((1, C)), wspec((1, C)),                    # ln2 w, b
            wspec((C, Hd)), wspec((1, Hd)),                  # fc1 w, b
            wspec((Hd, C)), wspec((1, C)),                   # fc2 w, b
        ]
        call = pl.pallas_call(
            partial(heuristic_block_kernel, num_heads=H),
            out_shape=jax.ShapeDtypeStruct((B * N, C), f32),
            grid=grid,
            in_specs=in_specs,
            out_specs=pl.BlockSpec((M, C), lambda i: (i, 0)),
            scratch_shapes=[pltpu.VMEM((M, C), f32)],
            compiler_params=pltpu.CompilerParams(
                dimension_semantics=("parallel",),
                vmem_limit_bytes=int(vmem_limit)),
        )
        return call(*operands)

    try:
        out2d = run(True)
    except Exception:
        # TODO(synk): pipeline_mode=pl.Buffered(1) (single-buffered resident
        # weights) not supported by this pallas_call lowering; falling back to
        # default double buffering.
        out2d = run(False)

    return out2d.reshape(B, N, C)


def reference_block(x, mask, p, num_heads):
    # Pure-JAX f32 replica of the PyTorch forward, for validation.
    def ln(z, w, b):
        mu = z.mean(-1, keepdims=True)
        var = ((z - mu) ** 2).mean(-1, keepdims=True)
        return (z - mu) / jnp.sqrt(var + 1e-5) * w + b

    B, N, C = x.shape
    D = C // num_heads
    xn = ln(x, p['ln1_w'], p['ln1_b'])
    qkv = (xn @ p['wqkv']).reshape(B, N, 3, num_heads, D).transpose(2, 0, 3, 1, 4)
    q, k, v = qkv[0], qkv[1], qkv[2]
    dots = jnp.einsum('bhnd,bhmd->bhnm', q, k) * D ** -0.5
    pm = mask[:, None, :, None] & mask[:, None, None, :]
    dots = jnp.where(pm, dots, -jnp.finfo(jnp.float32).max)
    attn = jax.nn.softmax(dots, axis=-1)
    ctx = jnp.einsum('bhnm,bhmd->bhnd', attn, v).transpose(0, 2, 1, 3).reshape(B, N, C)
    x1 = x + ctx @ p['wproj'] + p['bproj']
    x2n = ln(x1, p['ln2_w'], p['ln2_b'])
    h = jax.nn.gelu(x2n @ p['wfc1'] + p['bfc1'], approximate=False)
    return x1 + h @ p['wfc2'] + p['bfc2']


if __name__ == "__main__":
    B, N, C = 2, 8, 32
    num_heads = 4
    hidden = int(C * 4.0)

    key = jax.random.PRNGKey(0)
    ks = jax.random.split(key, 12)
    params = {
        'ln1_w': 1.0 + 0.1 * jax.random.normal(ks[8], (1, C), jnp.float32),
        'ln1_b': 0.1 * jax.random.normal(ks[9], (1, C), jnp.float32),
        'wqkv': 0.02 * jax.random.normal(ks[0], (C, 3 * C), jnp.float32),
        'wproj': 0.02 * jax.random.normal(ks[1], (C, C), jnp.float32),
        'bproj': 0.02 * jax.random.normal(ks[2], (1, C), jnp.float32),
        'ln2_w': 1.0 + 0.1 * jax.random.normal(ks[10], (1, C), jnp.float32),
        'ln2_b': 0.1 * jax.random.normal(ks[11], (1, C), jnp.float32),
        'wfc1': 0.02 * jax.random.normal(ks[3], (C, hidden), jnp.float32),
        'bfc1': 0.02 * jax.random.normal(ks[4], (1, hidden), jnp.float32),
        'wfc2': 0.02 * jax.random.normal(ks[5], (hidden, C), jnp.float32),
        'bfc2': 0.02 * jax.random.normal(ks[6], (1, C), jnp.float32),
    }

    x = jax.random.normal(ks[7], (B, N, C), jnp.float32)
    # boolean padding mask: batch 0 keeps all 8 tokens, batch 1 keeps first 5
    lengths = jnp.array([8, 5])
    mask = jnp.arange(N)[None, :] < lengths[:, None]      # (B, N) bool

    out = heuristic_block(x, mask, params, num_heads)
    out = jax.block_until_ready(out)

    ref = reference_block(x, mask, params, num_heads)
    assert out.shape == (B, N, C)
    max_err = jnp.max(jnp.abs(out - ref))
    # tolerance loosened vs the f32 / exact-erf reference: matmul operands are
    # bf16 (f32 accumulation), softmax uses approx reciprocal, GELU uses the
    # tanh approximation
    assert jnp.allclose(out, ref, atol=1e-2, rtol=1e-2), f"max abs err = {max_err}"

    print("KERNEL_OK")
</pallas_src>

<mosaic_0001>
module attributes {stable_mosaic.version = 11 : i64} {
  func.func @heuristic_block_kernel(%arg0: i32, %arg1: memref<8x32xf32, #tpu.memory_space<vmem>>, %arg2: memref<8x1xf32, #tpu.memory_space<vmem>>, %arg3: memref<1x1x8xf32, #tpu.memory_space<vmem>>, %arg4: memref<1x32xf32, #tpu.memory_space<vmem>>, %arg5: memref<1x32xf32, #tpu.memory_space<vmem>>, %arg6: memref<32x96xbf16, #tpu.memory_space<vmem>>, %arg7: memref<32x32xbf16, #tpu.memory_space<vmem>>, %arg8: memref<1x32xf32, #tpu.memory_space<vmem>>, %arg9: memref<1x32xf32, #tpu.memory_space<vmem>>, %arg10: memref<1x32xf32, #tpu.memory_space<vmem>>, %arg11: memref<32x128xbf16, #tpu.memory_space<vmem>>, %arg12: memref<1x128xf32, #tpu.memory_space<vmem>>, %arg13: memref<128x32xbf16, #tpu.memory_space<vmem>>, %arg14: memref<1x32xf32, #tpu.memory_space<vmem>>, %arg15: memref<8x32xf32, #tpu.memory_space<vmem>>, %arg16: memref<8x32xf32, #tpu.memory_space<vmem>>) attributes {dimension_semantics = [#tpu.dimension_semantics<parallel>], iteration_bounds = array<i64: 2>, scalar_prefetch = 0 : i64, scratch_operands = 1 : i64, tpu.core_type = #tpu.core_type<tc>, window_params = [{transform_indices = @transform_0, window_bounds = array<i64: 8, 32>}, {transform_indices = @transform_1, window_bounds = array<i64: 8, 1>}, {transform_indices = @transform_2, window_bounds = array<i64: 1, 1, 8>}, {pipeline_mode = #tpu.pipeline_mode<synchronous>, transform_indices = @transform_3, window_bounds = array<i64: 1, 32>}, {pipeline_mode = #tpu.pipeline_mode<synchronous>, transform_indices = @transform_4, window_bounds = array<i64: 1, 32>}, {pipeline_mode = #tpu.pipeline_mode<synchronous>, transform_indices = @transform_5, window_bounds = array<i64: 32, 96>}, {pipeline_mode = #tpu.pipeline_mode<synchronous>, transform_indices = @transform_6, window_bounds = array<i64: 32, 32>}, {pipeline_mode = #tpu.pipeline_mode<synchronous>, transform_indices = @transform_7, window_bounds = array<i64: 1, 32>}, {pipeline_mode = #tpu.pipeline_mode<synchronous>, transform_indices = @transform_8, window_bounds = array<i64: 1, 32>}, {pipeline_mode = #tpu.pipeline_mode<synchronous>, transform_indices = @transform_9, window_bounds = array<i64: 1, 32>}, {pipeline_mode = #tpu.pipeline_mode<synchronous>, transform_indices = @transform_10, window_bounds = array<i64: 32, 128>}, {pipeline_mode = #tpu.pipeline_mode<synchronous>, transform_indices = @transform_11, window_bounds = array<i64: 1, 128>}, {pipeline_mode = #tpu.pipeline_mode<synchronous>, transform_indices = @transform_12, window_bounds = array<i64: 128, 32>}, {pipeline_mode = #tpu.pipeline_mode<synchronous>, transform_indices = @transform_13, window_bounds = array<i64: 1, 32>}, {transform_indices = @transform_14, window_bounds = array<i64: 8, 32>}]} {
    %c0 = arith.constant 0 : index
    %c0_0 = arith.constant 0 : index
    %0 = vector.load %arg1[%c0, %c0_0] : memref<8x32xf32, #tpu.memory_space<vmem>>, vector<8x32xf32>
    %c0_1 = arith.constant 0 : index
    %c0_2 = arith.constant 0 : index
    %1 = vector.load %arg4[%c0_1, %c0_2] : memref<1x32xf32, #tpu.memory_space<vmem>>, vector<1x32xf32>
    %c0_3 = arith.constant 0 : index
    %c0_4 = arith.constant 0 : index
    %2 = vector.load %arg5[%c0_3, %c0_4] : memref<1x32xf32, #tpu.memory_space<vmem>>, vector<1x32xf32>
    %cst = arith.constant dense<0.000000e+00> : vector<8xf32>
    %3 = vector.multi_reduction <add>, %0, %cst [1] : vector<8x32xf32> to vector<8xf32>
    %4 = vector.shape_cast %3 : vector<8xf32> to vector<8x1xf32>
    %cst_5 = arith.constant 3.200000e+01 : f32
    %5 = vector.broadcast %cst_5 : f32 to vector<8x1xf32>
    %6 = arith.divf %4, %5 : vector<8x1xf32>
    %7 = arith.mulf %0, %0 : vector<8x32xf32>
    %cst_6 = arith.constant dense<0.000000e+00> : vector<8xf32>
    %8 = vector.multi_reduction <add>, %7, %cst_6 [1] : vector<8x32xf32> to vector<8xf32>
    %9 = vector.shape_cast %8 : vector<8xf32> to vector<8x1xf32>
    %cst_7 = arith.constant 3.200000e+01 : f32
    %10 = vector.broadcast %cst_7 : f32 to vector<8x1xf32>
    %11 = arith.divf %9, %10 : vector<8x1xf32>
    %12 = arith.mulf %6, %6 : vector<8x1xf32>
    %13 = arith.subf %11, %12 : vector<8x1xf32>
    %14 = vector.broadcast %6 : vector<8x1xf32> to vector<8x32xf32>
    %15 = arith.subf %0, %14 : vector<8x32xf32>
    %cst_8 = arith.constant 9.99999974E-6 : f32
    %16 = vector.broadcast %cst_8 : f32 to vector<8x1xf32>
    %17 = arith.addf %13, %16 : vector<8x1xf32>
    %18 = math.rsqrt %17 : vector<8x1xf32>
    %19 = vector.broadcast %18 : vector<8x1xf32> to vector<8x32xf32>
    %20 = arith.mulf %15, %19 : vector<8x32xf32>
    %21 = vector.broadcast %1 : vector<1x32xf32> to vector<8x32xf32>
    %22 = arith.mulf %20, %21 : vector<8x32xf32>
    %23 = vector.broadcast %2 : vector<1x32xf32> to vector<8x32xf32>
    %24 = arith.addf %22, %23 : vector<8x32xf32>
    %25 = arith.truncf %24 : vector<8x32xf32> to vector<8x32xbf16>
    %c0_9 = arith.constant 0 : index
    %c0_10 = arith.constant 0 : index
    %26 = vector.load %arg6[%c0_9, %c0_10] : memref<32x96xbf16, #tpu.memory_space<vmem>>, vector<32x96xbf16>
    %cst_11 = arith.constant dense<0.000000e+00> : vector<8x96xf32>
    %27 = tpu.matmul %25, %26, %cst_11 {dimension_numbers = #tpu.dot_dimension_numbers<[1], [0], [0], [1], [0, 0, 1, 1], [], []>} : vector<8x32xbf16>, vector<32x96xbf16>, vector<8x96xf32> -> vector<8x96xf32>
    %28 = vector.extract_strided_slice %27 {offsets = [0, 0], sizes = [8, 32], strides = [1, 1]} : vector<8x96xf32> to vector<8x32xf32>
    %29 = vector.extract_strided_slice %27 {offsets = [0, 32], sizes = [8, 32], strides = [1, 1]} : vector<8x96xf32> to vector<8x32xf32>
    %30 = vector.extract_strided_slice %27 {offsets = [0, 64], sizes = [8, 32], strides = [1, 1]} : vector<8x96xf32> to vector<8x32xf32>
    %c0_12 = arith.constant 0 : index
    %c0_13 = arith.constant 0 : index
    %31 = vector.load %arg2[%c0_12, %c0_13] : memref<8x1xf32, #tpu.memory_space<vmem>>, vector<8x1xf32>
    %c0_14 = arith.constant 0 : index
    %c0_15 = arith.constant 0 : index
    %c0_16 = arith.constant 0 : index
    %32 = vector.load %arg3[%c0_14, %c0_15, %c0_16] : memref<1x1x8xf32, #tpu.memory_space<vmem>>, vector<1x1x8xf32>
    %33 = vector.shape_cast %32 : vector<1x1x8xf32> to vector<1x8xf32>
    %34 = vector.broadcast %31 : vector<8x1xf32> to vector<8x8xf32>
    %35 = vector.broadcast %33 : vector<1x8xf32> to vector<8x8xf32>
    %36 = arith.mulf %34, %35 : vector<8x8xf32>
    %cst_17 = arith.constant 1.000000e+00 : f32
    %37 = vector.broadcast %cst_17 : f32 to vector<8x8xf32>
    %38 = arith.subf %36, %37 : vector<8x8xf32>
    %cst_18 = arith.constant 1.000000e+30 : f32
    %39 = vector.broadcast %cst_18 : f32 to vector<8x8xf32>
    %40 = arith.mulf %38, %39 : vector<8x8xf32>
    %41 = vector.extract_strided_slice %28 {offsets = [0, 0], sizes = [8, 8], strides = [1, 1]} : vector<8x32xf32> to vector<8x8xf32>
    %42 = arith.truncf %41 : vector<8x8xf32> to vector<8x8xbf16>
    %43 = vector.extract_strided_slice %29 {offsets = [0, 0], sizes = [8, 8], strides = [1, 1]} : vector<8x32xf32> to vector<8x8xf32>
    %44 = arith.truncf %43 : vector<8x8xf32> to vector<8x8xbf16>
    %45 = vector.extract_strided_slice %30 {offsets = [0, 0], sizes = [8, 8], strides = [1, 1]} : vector<8x32xf32> to vector<8x8xf32>
    %46 = arith.truncf %45 : vector<8x8xf32> to vector<8x8xbf16>
    %cst_19 = arith.constant dense<0.000000e+00> : vector<8x8xf32>
    %47 = tpu.matmul %42, %44, %cst_19 {dimension_numbers = #tpu.dot_dimension_numbers<[1], [1], [0], [0], [0, 0, 1, 0], [], []>} : vector<8x8xbf16>, vector<8x8xbf16>, vector<8x8xf32> -> vector<8x8xf32>
    %48 = arith.mulf %47, %36 : vector<8x8xf32>
    %49 = arith.addf %48, %40 : vector<8x8xf32>
    %cst_20 = arith.constant dense<0xFF800000> : vector<8xf32>
    %50 = vector.multi_reduction <maximumf>, %49, %cst_20 [1] : vector<8x8xf32> to vector<8xf32>
    %51 = vector.shape_cast %50 : vector<8xf32> to vector<8x1xf32>
    %52 = vector.broadcast %51 : vector<8x1xf32> to vector<8x8xf32>
    %53 = arith.subf %49, %52 : vector<8x8xf32>
    %54 = math.exp %53 : vector<8x8xf32>
    %cst_21 = arith.constant dense<0.000000e+00> : vector<8xf32>
    %55 = vector.multi_reduction <add>, %54, %cst_21 [1] : vector<8x8xf32> to vector<8xf32>
    %56 = vector.shape_cast %55 : vector<8xf32> to vector<8x1xf32>
    %57 = tpu.reciprocal %56 {approx = true} : vector<8x1xf32> -> vector<8x1xf32>
    %58 = vector.broadcast %57 : vector<8x1xf32> to vector<8x8xf32>
    %59 = arith.mulf %54, %58 : vector<8x8xf32>
    %60 = arith.truncf %59 : vector<8x8xf32> to vector<8x8xbf16>
    %cst_22 = arith.constant dense<0.000000e+00> : vector<8x8xf32>
    %61 = tpu.matmul %60, %46, %cst_22 {dimension_numbers = #tpu.dot_dimension_numbers<[1], [0], [0], [1], [0, 0, 1, 1], [], []>} : vector<8x8xbf16>, vector<8x8xbf16>, vector<8x8xf32> -> vector<8x8xf32>
    %c0_23 = arith.constant 0 : index
    %c0_24 = arith.constant 0 : index
    %62 = vector.load %arg16[%c0_23, %c0_24] : memref<8x32xf32, #tpu.memory_space<vmem>>, vector<8x8xf32>
    tpu.vector_store %arg16[%c0_23, %c0_24], %61 {strides = array<i32>} : memref<8x32xf32, #tpu.memory_space<vmem>>, vector<8x8xf32>,
    %63 = vector.extract_strided_slice %28 {offsets = [0, 8], sizes = [8, 8], strides = [1, 1]} : vector<8x32xf32> to vector<8x8xf32>
    %64 = arith.truncf %63 : vector<8x8xf32> to vector<8x8xbf16>
    %65 = vector.extract_strided_slice %29 {offsets = [0, 8], sizes = [8, 8], strides = [1, 1]} : vector<8x32xf32> to vector<8x8xf32>
    %66 = arith.truncf %65 : vector<8x8xf32> to vector<8x8xbf16>
    %67 = vector.extract_strided_slice %30 {offsets = [0, 8], sizes = [8, 8], strides = [1, 1]} : vector<8x32xf32> to vector<8x8xf32>
    %68 = arith.truncf %67 : vector<8x8xf32> to vector<8x8xbf16>
    %cst_25 = arith.constant dense<0.000000e+00> : vector<8x8xf32>
    %69 = tpu.matmul %64, %66, %cst_25 {dimension_numbers = #tpu.dot_dimension_numbers<[1], [1], [0], [0], [0, 0, 1, 0], [], []>} : vector<8x8xbf16>, vector<8x8xbf16>, vector<8x8xf32> -> vector<8x8xf32>
    %70 = arith.mulf %69, %36 : vector<8x8xf32>
    %71 = arith.addf %70, %40 : vector<8x8xf32>
    %cst_26 = arith.constant dense<0xFF800000> : vector<8xf32>
    %72 = vector.multi_reduction <maximumf>, %71, %cst_26 [1] : vector<8x8xf32> to vector<8xf32>
    %73 = vector.shape_cast %72 : vector<8xf32> to vector<8x1xf32>
    %74 = vector.broadcast %73 : vector<8x1xf32> to vector<8x8xf32>
    %75 = arith.subf %71, %74 : vector<8x8xf32>
    %76 = math.exp %75 : vector<8x8xf32>
    %cst_27 = arith.constant dense<0.000000e+00> : vector<8xf32>
    %77 = vector.multi_reduction <add>, %76, %cst_27 [1] : vector<8x8xf32> to vector<8xf32>
    %78 = vector.shape_cast %77 : vector<8xf32> to vector<8x1xf32>
    %79 = tpu.reciprocal %78 {approx = true} : vector<8x1xf32> -> vector<8x1xf32>
    %80 = vector.broadcast %79 : vector<8x1xf32> to vector<8x8xf32>
    %81 = arith.mulf %76, %80 : vector<8x8xf32>
    %82 = arith.truncf %81 : vector<8x8xf32> to vector<8x8xbf16>
    %cst_28 = arith.constant dense<0.000000e+00> : vector<8x8xf32>
    %83 = tpu.matmul %82, %68, %cst_28 {dimension_numbers = #tpu.dot_dimension_numbers<[1], [0], [0], [1], [0, 0, 1, 1], [], []>} : vector<8x8xbf16>, vector<8x8xbf16>, vector<8x8xf32> -> vector<8x8xf32>
    %c0_29 = arith.constant 0 : index
    %c8 = arith.constant 8 : index
    %84 = vector.load %arg16[%c0_29, %c8] : memref<8x32xf32, #tpu.memory_space<vmem>>, vector<8x8xf32>
    tpu.vector_store %arg16[%c0_29, %c8], %83 {strides = array<i32>} : memref<8x32xf32, #tpu.memory_space<vmem>>, vector<8x8xf32>,
    %85 = vector.extract_strided_slice %28 {offsets = [0, 16], sizes = [8, 8], strides = [1, 1]} : vector<8x32xf32> to vector<8x8xf32>
    %86 = arith.truncf %85 : vector<8x8xf32> to vector<8x8xbf16>
    %87 = vector.extract_strided_slice %29 {offsets = [0, 16], sizes = [8, 8], strides = [1, 1]} : vector<8x32xf32> to vector<8x8xf32>
    %88 = arith.truncf %87 : vector<8x8xf32> to vector<8x8xbf16>
    %89 = vector.extract_strided_slice %30 {offsets = [0, 16], sizes = [8, 8], strides = [1, 1]} : vector<8x32xf32> to vector<8x8xf32>
    %90 = arith.truncf %89 : vector<8x8xf32> to vector<8x8xbf16>
    %cst_30 = arith.constant dense<0.000000e+00> : vector<8x8xf32>
    %91 = tpu.matmul %86, %88, %cst_30 {dimension_numbers = #tpu.dot_dimension_numbers<[1], [1], [0], [0], [0, 0, 1, 0], [], []>} : vector<8x8xbf16>, vector<8x8xbf16>, vector<8x8xf32> -> vector<8x8xf32>
    %92 = arith.mulf %91, %36 : vector<8x8xf32>
    %93 = arith.addf %92, %40 : vector<8x8xf32>
    %cst_31 = arith.constant dense<0xFF800000> : vector<8xf32>
    %94 = vector.multi_reduction <maximumf>, %93, %cst_31 [1] : vector<8x8xf32> to vector<8xf32>
    %95 = vector.shape_cast %94 : vector<8xf32> to vector<8x1xf32>
    %96 = vector.broadcast %95 : vector<8x1xf32> to vector<8x8xf32>
    %97 = arith.subf %93, %96 : vector<8x8xf32>
    %98 = math.exp %97 : vector<8x8xf32>
    %cst_32 = arith.constant dense<0.000000e+00> : vector<8xf32>
    %99 = vector.multi_reduction <add>, %98, %cst_32 [1] : vector<8x8xf32> to vector<8xf32>
    %100 = vector.shape_cast %99 : vector<8xf32> to vector<8x1xf32>
    %101 = tpu.reciprocal %100 {approx = true} : vector<8x1xf32> -> vector<8x1xf32>
    %102 = vector.broadcast %101 : vector<8x1xf32> to vector<8x8xf32>
    %103 = arith.mulf %98, %102 : vector<8x8xf32>
    %104 = arith.truncf %103 : vector<8x8xf32> to vector<8x8xbf16>
    %cst_33 = arith.constant dense<0.000000e+00> : vector<8x8xf32>
    %105 = tpu.matmul %104, %90, %cst_33 {dimension_numbers = #tpu.dot_dimension_numbers<[1], [0], [0], [1], [0, 0, 1, 1], [], []>} : vector<8x8xbf16>, vector<8x8xbf16>, vector<8x8xf32> -> vector<8x8xf32>
    %c0_34 = arith.constant 0 : index
    %c16 = arith.constant 16 : index
    %106 = vector.load %arg16[%c0_34, %c16] : memref<8x32xf32, #tpu.memory_space<vmem>>, vector<8x8xf32>
    tpu.vector_store %arg16[%c0_34, %c16], %105 {strides = array<i32>} : memref<8x32xf32, #tpu.memory_space<vmem>>, vector<8x8xf32>,
    %107 = vector.extract_strided_slice %28 {offsets = [0, 24], sizes = [8, 8], strides = [1, 1]} : vector<8x32xf32> to vector<8x8xf32>
    %108 = arith.truncf %107 : vector<8x8xf32> to vector<8x8xbf16>
    %109 = vector.extract_strided_slice %29 {offsets = [0, 24], sizes = [8, 8], strides = [1, 1]} : vector<8x32xf32> to vector<8x8xf32>
    %110 = arith.truncf %109 : vector<8x8xf32> to vector<8x8xbf16>
    %111 = vector.extract_strided_slice %30 {offsets = [0, 24], sizes = [8, 8], strides = [1, 1]} : vector<8x32xf32> to vector<8x8xf32>
    %112 = arith.truncf %111 : vector<8x8xf32> to vector<8x8xbf16>
    %cst_35 = arith.constant dense<0.000000e+00> : vector<8x8xf32>
    %113 = tpu.matmul %108, %110, %cst_35 {dimension_numbers = #tpu.dot_dimension_numbers<[1], [1], [0], [0], [0, 0, 1, 0], [], []>} : vector<8x8xbf16>, vector<8x8xbf16>, vector<8x8xf32> -> vector<8x8xf32>
    %114 = arith.mulf %113, %36 : vector<8x8xf32>
    %115 = arith.addf %114, %40 : vector<8x8xf32>
    %cst_36 = arith.constant dense<0xFF800000> : vector<8xf32>
    %116 = vector.multi_reduction <maximumf>, %115, %cst_36 [1] : vector<8x8xf32> to vector<8xf32>
    %117 = vector.shape_cast %116 : vector<8xf32> to vector<8x1xf32>
    %118 = vector.broadcast %117 : vector<8x1xf32> to vector<8x8xf32>
    %119 = arith.subf %115, %118 : vector<8x8xf32>
    %120 = math.exp %119 : vector<8x8xf32>
    %cst_37 = arith.constant dense<0.000000e+00> : vector<8xf32>
    %121 = vector.multi_reduction <add>, %120, %cst_37 [1] : vector<8x8xf32> to vector<8xf32>
    %122 = vector.shape_cast %121 : vector<8xf32> to vector<8x1xf32>
    %123 = tpu.reciprocal %122 {approx = true} : vector<8x1xf32> -> vector<8x1xf32>
    %124 = vector.broadcast %123 : vector<8x1xf32> to vector<8x8xf32>
    %125 = arith.mulf %120, %124 : vector<8x8xf32>
    %126 = arith.truncf %125 : vector<8x8xf32> to vector<8x8xbf16>
    %cst_38 = arith.constant dense<0.000000e+00> : vector<8x8xf32>
    %127 = tpu.matmul %126, %112, %cst_38 {dimension_numbers = #tpu.dot_dimension_numbers<[1], [0], [0], [1], [0, 0, 1, 1], [], []>} : vector<8x8xbf16>, vector<8x8xbf16>, vector<8x8xf32> -> vector<8x8xf32>
    %c0_39 = arith.constant 0 : index
    %c24 = arith.constant 24 : index
    %128 = vector.load %arg16[%c0_39, %c24] : memref<8x32xf32, #tpu.memory_space<vmem>>, vector<8x8xf32>
    tpu.vector_store %arg16[%c0_39, %c24], %127 {strides = array<i32>} : memref<8x32xf32, #tpu.memory_space<vmem>>, vector<8x8xf32>,
    %c0_40 = arith.constant 0 : index
    %c0_41 = arith.constant 0 : index
    %129 = vector.load %arg16[%c0_40, %c0_41] : memref<8x32xf32, #tpu.memory_space<vmem>>, vector<8x32xf32>
    %130 = arith.truncf %129 : vector<8x32xf32> to vector<8x32xbf16>
    %c0_42 = arith.constant 0 : index
    %c0_43 = arith.constant 0 : index
    %131 = vector.load %arg7[%c0_42, %c0_43] : memref<32x32xbf16, #tpu.memory_space<vmem>>, vector<32x32xbf16>
    %cst_44 = arith.constant dense<0.000000e+00> : vector<8x32xf32>
    %132 = tpu.matmul %130, %131, %cst_44 {dimension_numbers = #tpu.dot_dimension_numbers<[1], [0], [0], [1], [0, 0, 1, 1], [], []>} : vector<8x32xbf16>, vector<32x32xbf16>, vector<8x32xf32> -> vector<8x32xf32>
    %c0_45 = arith.constant 0 : index
    %c0_46 = arith.constant 0 : index
    %133 = vector.load %arg8[%c0_45, %c0_46] : memref<1x32xf32, #tpu.memory_space<vmem>>, vector<1x32xf32>
    %134 = vector.broadcast %133 : vector<1x32xf32> to vector<8x32xf32>
    %135 = arith.addf %132, %134 : vector<8x32xf32>
    %136 = arith.addf %0, %135 : vector<8x32xf32>
    %c0_47 = arith.constant 0 : index
    %c0_48 = arith.constant 0 : index
    %137 = vector.load %arg9[%c0_47, %c0_48] : memref<1x32xf32, #tpu.memory_space<vmem>>, vector<1x32xf32>
    %c0_49 = arith.constant 0 : index
    %c0_50 = arith.constant 0 : index
    %138 = vector.load %arg10[%c0_49, %c0_50] : memref<1x32xf32, #tpu.memory_space<vmem>>, vector<1x32xf32>
    %cst_51 = arith.constant dense<0.000000e+00> : vector<8xf32>
    %139 = vector.multi_reduction <add>, %136, %cst_51 [1] : vector<8x32xf32> to vector<8xf32>
    %140 = vector.shape_cast %139 : vector<8xf32> to vector<8x1xf32>
    %cst_52 = arith.constant 3.200000e+01 : f32
    %141 = vector.broadcast %cst_52 : f32 to vector<8x1xf32>
    %142 = arith.divf %140, %141 : vector<8x1xf32>
    %143 = arith.mulf %136, %136 : vector<8x32xf32>
    %cst_53 = arith.constant dense<0.000000e+00> : vector<8xf32>
    %144 = vector.multi_reduction <add>, %143, %cst_53 [1] : vector<8x32xf32> to vector<8xf32>
    %145 = vector.shape_cast %144 : vector<8xf32> to vector<8x1xf32>
    %cst_54 = arith.constant 3.200000e+01 : f32
    %146 = vector.broadcast %cst_54 : f32 to vector<8x1xf32>
    %147 = arith.divf %145, %146 : vector<8x1xf32>
    %148 = arith.mulf %142, %142 : vector<8x1xf32>
    %149 = arith.subf %147, %148 : vector<8x1xf32>
    %150 = vector.broadcast %142 : vector<8x1xf32> to vector<8x32xf32>
    %151 = arith.subf %136, %150 : vector<8x32xf32>
    %cst_55 = arith.constant 9.99999974E-6 : f32
    %152 = vector.broadcast %cst_55 : f32 to vector<8x1xf32>
    %153 = arith.addf %149, %152 : vector<8x1xf32>
    %154 = math.rsqrt %153 : vector<8x1xf32>
    %155 = vector.broadcast %154 : vector<8x1xf32> to vector<8x32xf32>
    %156 = arith.mulf %151, %155 : vector<8x32xf32>
    %157 = vector.broadcast %137 : vector<1x32xf32> to vector<8x32xf32>
    %158 = arith.mulf %156, %157 : vector<8x32xf32>
    %159 = vector.broadcast %138 : vector<1x32xf32> to vector<8x32xf32>
    %160 = arith.addf %158, %159 : vector<8x32xf32>
    %161 = arith.truncf %160 : vector<8x32xf32> to vector<8x32xbf16>
    %c0_56 = arith.constant 0 : index
    %c0_57 = arith.constant 0 : index
    %162 = vector.load %arg11[%c0_56, %c0_57] : memref<32x128xbf16, #tpu.memory_space<vmem>>, vector<32x128xbf16>
    %cst_58 = arith.constant dense<0.000000e+00> : vector<8x128xf32>
    %163 = tpu.matmul %161, %162, %cst_58 {dimension_numbers = #tpu.dot_dimension_numbers<[1], [0], [0], [1], [0, 0, 1, 1], [], []>} : vector<8x32xbf16>, vector<32x128xbf16>, vector<8x128xf32> -> vector<8x128xf32>
    %c0_59 = arith.constant 0 : index
    %c0_60 = arith.constant 0 : index
    %164 = vector.load %arg12[%c0_59, %c0_60] : memref<1x128xf32, #tpu.memory_space<vmem>>, vector<1x128xf32>
    %165 = vector.broadcast %164 : vector<1x128xf32> to vector<8x128xf32>
    %166 = arith.addf %163, %165 : vector<8x128xf32>
    %167 = arith.mulf %166, %166 : vector<8x128xf32>
    %168 = arith.mulf %166, %167 : vector<8x128xf32>
    %cst_61 = arith.constant 4.471500e-02 : f32
    %169 = vector.broadcast %cst_61 : f32 to vector<8x128xf32>
    %170 = arith.mulf %169, %168 : vector<8x128xf32>
    %171 = arith.addf %166, %170 : vector<8x128xf32>
    %cst_62 = arith.constant 0.797884583 : f32
    %172 = vector.broadcast %cst_62 : f32 to vector<8x128xf32>
    %173 = arith.mulf %172, %171 : vector<8x128xf32>
    %174 = math.tanh %173 : vector<8x128xf32>
    %cst_63 = arith.constant 1.000000e+00 : f32
    %175 = vector.broadcast %cst_63 : f32 to vector<8x128xf32>
    %176 = arith.addf %175, %174 : vector<8x128xf32>
    %cst_64 = arith.constant 5.000000e-01 : f32
    %177 = vector.broadcast %cst_64 : f32 to vector<8x128xf32>
    %178 = arith.mulf %177, %176 : vector<8x128xf32>
    %179 = arith.mulf %166, %178 : vector<8x128xf32>
    %180 = arith.truncf %179 : vector<8x128xf32> to vector<8x128xbf16>
    %c0_65 = arith.constant 0 : index
    %c0_66 = arith.constant 0 : index
    %181 = vector.load %arg13[%c0_65, %c0_66] : memref<128x32xbf16, #tpu.memory_space<vmem>>, vector<128x32xbf16>
    %cst_67 = arith.constant dense<0.000000e+00> : vector<8x32xf32>
    %182 = tpu.matmul %180, %181, %cst_67 {dimension_numbers = #tpu.dot_dimension_numbers<[1], [0], [0], [1], [0, 0, 1, 1], [], []>} : vector<8x128xbf16>, vector<128x32xbf16>, vector<8x32xf32> -> vector<8x32xf32>
    %c0_68 = arith.constant 0 : index
    %c0_69 = arith.constant 0 : index
    %183 = vector.load %arg14[%c0_68, %c0_69] : memref<1x32xf32, #tpu.memory_space<vmem>>, vector<1x32xf32>
    %184 = vector.broadcast %183 : vector<1x32xf32> to vector<8x32xf32>
    %185 = arith.addf %182, %184 : vector<8x32xf32>
    %186 = arith.addf %136, %185 : vector<8x32xf32>
    %c0_70 = arith.constant 0 : index
    %c0_71 = arith.constant 0 : index
    %187 = vector.load %arg15[%c0_70, %c0_71] : memref<8x32xf32, #tpu.memory_space<vmem>>, vector<8x32xf32>
    tpu.vector_store %arg15[%c0_70, %c0_71], %186 {strides = array<i32>} : memref<8x32xf32, #tpu.memory_space<vmem>>, vector<8x32xf32>,
    return
  }
  func.func @transform_0(%arg0: i32) -> (i32, i32) {
    %c0_i32 = arith.constant 0 : i32
    %c0_i32_0 = arith.constant 0 : i32
    return %arg0, %c0_i32 : i32, i32
  }
  func.func @transform_1(%arg0: i32) -> (i32, i32) {
    %c0_i32 = arith.constant 0 : i32
    %c0_i32_0 = arith.constant 0 : i32
    return %arg0, %c0_i32 : i32, i32
  }
  func.func @transform_2(%arg0: i32) -> (i32, i32, i32) {
    %c0_i32 = arith.constant 0 : i32
    %c0_i32_0 = arith.constant 0 : i32
    %c0_i32_1 = arith.constant 0 : i32
    return %arg0, %c0_i32, %c0_i32_0 : i32, i32, i32
  }
  func.func @transform_3(%arg0: i32) -> (i32, i32) {
    %c0_i32 = arith.constant 0 : i32
    %c0_i32_0 = arith.constant 0 : i32
    %c0_i32_1 = arith.constant 0 : i32
    return %c0_i32, %c0_i32_0 : i32, i32
  }
  func.func @transform_4(%arg0: i32) -> (i32, i32) {
    %c0_i32 = arith.constant 0 : i32
    %c0_i32_0 = arith.constant 0 : i32
    %c0_i32_1 = arith.constant 0 : i32
    return %c0_i32, %c0_i32_0 : i32, i32
  }
  func.func @transform_5(%arg0: i32) -> (i32, i32) {
    %c0_i32 = arith.constant 0 : i32
    %c0_i32_0 = arith.constant 0 : i32
    %c0_i32_1 = arith.constant 0 : i32
    return %c0_i32, %c0_i32_0 : i32, i32
  }
  func.func @transform_6(%arg0: i32) -> (i32, i32) {
    %c0_i32 = arith.constant 0 : i32
    %c0_i32_0 = arith.constant 0 : i32
    %c0_i32_1 = arith.constant 0 : i32
    return %c0_i32, %c0_i32_0 : i32, i32
  }
  func.func @transform_7(%arg0: i32) -> (i32, i32) {
    %c0_i32 = arith.constant 0 : i32
    %c0_i32_0 = arith.constant 0 : i32
    %c0_i32_1 = arith.constant 0 : i32
    return %c0_i32, %c0_i32_0 : i32, i32
  }
  func.func @transform_8(%arg0: i32) -> (i32, i32) {
    %c0_i32 = arith.constant 0 : i32
    %c0_i32_0 = arith.constant 0 : i32
    %c0_i32_1 = arith.constant 0 : i32
    return %c0_i32, %c0_i32_0 : i32, i32
  }
  func.func @transform_9(%arg0: i32) -> (i32, i32) {
    %c0_i32 = arith.constant 0 : i32
    %c0_i32_0 = arith.constant 0 : i32
    %c0_i32_1 = arith.constant 0 : i32
    return %c0_i32, %c0_i32_0 : i32, i32
  }
  func.func @transform_10(%arg0: i32) -> (i32, i32) {
    %c0_i32 = arith.constant 0 : i32
    %c0_i32_0 = arith.constant 0 : i32
    %c0_i32_1 = arith.constant 0 : i32
    return %c0_i32, %c0_i32_0 : i32, i32
  }
  func.func @transform_11(%arg0: i32) -> (i32, i32) {
    %c0_i32 = arith.constant 0 : i32
    %c0_i32_0 = arith.constant 0 : i32
    %c0_i32_1 = arith.constant 0 : i32
    return %c0_i32, %c0_i32_0 : i32, i32
  }
  func.func @transform_12(%arg0: i32) -> (i32, i32) {
    %c0_i32 = arith.constant 0 : i32
    %c0_i32_0 = arith.constant 0 : i32
    %c0_i32_1 = arith.constant 0 : i32
    return %c0_i32, %c0_i32_0 : i32, i32
  }
  func.func @transform_13(%arg0: i32) -> (i32, i32) {
    %c0_i32 = arith.constant 0 : i32
    %c0_i32_0 = arith.constant 0 : i32
    %c0_i32_1 = arith.constant 0 : i32
    return %c0_i32, %c0_i32_0 : i32, i32
  }
  func.func @transform_14(%arg0: i32) -> (i32, i32) {
    %c0_i32 = arith.constant 0 : i32
    %c0_i32_0 = arith.constant 0 : i32
    return %arg0, %c0_i32 : i32, i32
  }
}

module attributes {stable_mosaic.version = 11 : i64} {
  func.func @heuristic_block_kernel(%arg0: i32, %arg1: memref<8x32xf32, #tpu.memory_space<vmem>>, %arg2: memref<8x1xf32, #tpu.memory_space<vmem>>, %arg3: memref<1x1x8xf32, #tpu.memory_space<vmem>>, %arg4: memref<1x32xf32, #tpu.memory_space<vmem>>, %arg5: memref<1x32xf32, #tpu.memory_space<vmem>>, %arg6: memref<32x96xbf16, #tpu.memory_space<vmem>>, %arg7: memref<32x32xbf16, #tpu.memory_space<vmem>>, %arg8: memref<1x32xf32, #tpu.memory_space<vmem>>, %arg9: memref<1x32xf32, #tpu.memory_space<vmem>>, %arg10: memref<1x32xf32, #tpu.memory_space<vmem>>, %arg11: memref<32x128xbf16, #tpu.memory_space<vmem>>, %arg12: memref<1x128xf32, #tpu.memory_space<vmem>>, %arg13: memref<128x32xbf16, #tpu.memory_space<vmem>>, %arg14: memref<1x32xf32, #tpu.memory_space<vmem>>, %arg15: memref<8x32xf32, #tpu.memory_space<vmem>>, %arg16: memref<8x32xf32, #tpu.memory_space<vmem>>) attributes {dimension_semantics = [#tpu.dimension_semantics<parallel>], iteration_bounds = array<i64: 2>, scalar_prefetch = 0 : i64, scratch_operands = 1 : i64, tpu.core_type = #tpu.core_type<tc>, window_params = [{transform_indices = @transform_0, window_bounds = array<i64: 8, 32>}, {transform_indices = @transform_1, window_bounds = array<i64: 8, 1>}, {transform_indices = @transform_2, window_bounds = array<i64: 1, 1, 8>}, {pipeline_mode = #tpu.pipeline_mode<synchronous>, transform_indices = @transform_3, window_bounds = array<i64: 1, 32>}, {pipeline_mode = #tpu.pipeline_mode<synchronous>, transform_indices = @transform_4, window_bounds = array<i64: 1, 32>}, {pipeline_mode = #tpu.pipeline_mode<synchronous>, transform_indices = @transform_5, window_bounds = array<i64: 32, 96>}, {pipeline_mode = #tpu.pipeline_mode<synchronous>, transform_indices = @transform_6, window_bounds = array<i64: 32, 32>}, {pipeline_mode = #tpu.pipeline_mode<synchronous>, transform_indices = @transform_7, window_bounds = array<i64: 1, 32>}, {pipeline_mode = #tpu.pipeline_mode<synchronous>, transform_indices = @transform_8, window_bounds = array<i64: 1, 32>}, {pipeline_mode = #tpu.pipeline_mode<synchronous>, transform_indices = @transform_9, window_bounds = array<i64: 1, 32>}, {pipeline_mode = #tpu.pipeline_mode<synchronous>, transform_indices = @transform_10, window_bounds = array<i64: 32, 128>}, {pipeline_mode = #tpu.pipeline_mode<synchronous>, transform_indices = @transform_11, window_bounds = array<i64: 1, 128>}, {pipeline_mode = #tpu.pipeline_mode<synchronous>, transform_indices = @transform_12, window_bounds = array<i64: 128, 32>}, {pipeline_mode = #tpu.pipeline_mode<synchronous>, transform_indices = @transform_13, window_bounds = array<i64: 1, 32>}, {transform_indices = @transform_14, window_bounds = array<i64: 8, 32>}]} {
    %c0 = arith.constant 0 : index
    %c0_0 = arith.constant 0 : index
    %0 = vector.load %arg1[%c0, %c0_0] : memref<8x32xf32, #tpu.memory_space<vmem>>, vector<8x32xf32>
    %c0_1 = arith.constant 0 : index
    %c0_2 = arith.constant 0 : index
    %1 = vector.load %arg4[%c0_1, %c0_2] : memref<1x32xf32, #tpu.memory_space<vmem>>, vector<1x32xf32>
    %c0_3 = arith.constant 0 : index
    %c0_4 = arith.constant 0 : index
    %2 = vector.load %arg5[%c0_3, %c0_4] : memref<1x32xf32, #tpu.memory_space<vmem>>, vector<1x32xf32>
    %cst = arith.constant dense<0.000000e+00> : vector<8xf32>
    %3 = vector.multi_reduction <add>, %0, %cst [1] : vector<8x32xf32> to vector<8xf32>
    %4 = vector.shape_cast %3 : vector<8xf32> to vector<8x1xf32>
    %cst_5 = arith.constant 3.200000e+01 : f32
    %5 = vector.broadcast %cst_5 : f32 to vector<8x1xf32>
    %6 = arith.divf %4, %5 : vector<8x1xf32>
    %7 = arith.mulf %0, %0 : vector<8x32xf32>
    %cst_6 = arith.constant dense<0.000000e+00> : vector<8xf32>
    %8 = vector.multi_reduction <add>, %7, %cst_6 [1] : vector<8x32xf32> to vector<8xf32>
    %9 = vector.shape_cast %8 : vector<8xf32> to vector<8x1xf32>
    %cst_7 = arith.constant 3.200000e+01 : f32
    %10 = vector.broadcast %cst_7 : f32 to vector<8x1xf32>
    %11 = arith.divf %9, %10 : vector<8x1xf32>
    %12 = arith.mulf %6, %6 : vector<8x1xf32>
    %13 = arith.subf %11, %12 : vector<8x1xf32>
    %14 = vector.broadcast %6 : vector<8x1xf32> to vector<8x32xf32>
    %15 = arith.subf %0, %14 : vector<8x32xf32>
    %cst_8 = arith.constant 9.99999974E-6 : f32
    %16 = vector.broadcast %cst_8 : f32 to vector<8x1xf32>
    %17 = arith.addf %13, %16 : vector<8x1xf32>
    %18 = math.rsqrt %17 : vector<8x1xf32>
    %19 = vector.broadcast %18 : vector<8x1xf32> to vector<8x32xf32>
    %20 = arith.mulf %15, %19 : vector<8x32xf32>
    %21 = vector.broadcast %1 : vector<1x32xf32> to vector<8x32xf32>
    %22 = arith.mulf %20, %21 : vector<8x32xf32>
    %23 = vector.broadcast %2 : vector<1x32xf32> to vector<8x32xf32>
    %24 = arith.addf %22, %23 : vector<8x32xf32>
    %25 = arith.truncf %24 : vector<8x32xf32> to vector<8x32xbf16>
    %c0_9 = arith.constant 0 : index
    %c0_10 = arith.constant 0 : index
    %26 = vector.load %arg6[%c0_9, %c0_10] : memref<32x96xbf16, #tpu.memory_space<vmem>>, vector<32x96xbf16>
    %cst_11 = arith.constant dense<0.000000e+00> : vector<8x96xf32>
    %27 = tpu.matmul %25, %26, %cst_11 {dimension_numbers = #tpu.dot_dimension_numbers<[1], [0], [0], [1], [0, 0, 1, 1], [], []>} : vector<8x32xbf16>, vector<32x96xbf16>, vector<8x96xf32> -> vector<8x96xf32>
    %28 = vector.extract_strided_slice %27 {offsets = [0, 0], sizes = [8, 32], strides = [1, 1]} : vector<8x96xf32> to vector<8x32xf32>
    %29 = vector.extract_strided_slice %27 {offsets = [0, 32], sizes = [8, 32], strides = [1, 1]} : vector<8x96xf32> to vector<8x32xf32>
    %30 = vector.extract_strided_slice %27 {offsets = [0, 64], sizes = [8, 32], strides = [1, 1]} : vector<8x96xf32> to vector<8x32xf32>
    %c0_12 = arith.constant 0 : index
    %c0_13 = arith.constant 0 : index
    %31 = vector.load %arg2[%c0_12, %c0_13] : memref<8x1xf32, #tpu.memory_space<vmem>>, vector<8x1xf32>
    %c0_14 = arith.constant 0 : index
    %c0_15 = arith.constant 0 : index
    %c0_16 = arith.constant 0 : index
    %32 = vector.load %arg3[%c0_14, %c0_15, %c0_16] : memref<1x1x8xf32, #tpu.memory_space<vmem>>, vector<1x1x8xf32>
    %33 = vector.shape_cast %32 : vector<1x1x8xf32> to vector<1x8xf32>
    %34 = vector.broadcast %31 : vector<8x1xf32> to vector<8x8xf32>
    %35 = vector.broadcast %33 : vector<1x8xf32> to vector<8x8xf32>
    %36 = arith.mulf %34, %35 : vector<8x8xf32>
    %cst_17 = arith.constant 1.000000e+00 : f32
    %37 = vector.broadcast %cst_17 : f32 to vector<8x8xf32>
    %38 = arith.subf %36, %37 : vector<8x8xf32>
    %cst_18 = arith.constant 1.000000e+30 : f32
    %39 = vector.broadcast %cst_18 : f32 to vector<8x8xf32>
    %40 = arith.mulf %38, %39 : vector<8x8xf32>
    %41 = vector.extract_strided_slice %28 {offsets = [0, 0], sizes = [8, 8], strides = [1, 1]} : vector<8x32xf32> to vector<8x8xf32>
    %42 = arith.truncf %41 : vector<8x8xf32> to vector<8x8xbf16>
    %43 = vector.extract_strided_slice %29 {offsets = [0, 0], sizes = [8, 8], strides = [1, 1]} : vector<8x32xf32> to vector<8x8xf32>
    %44 = arith.truncf %43 : vector<8x8xf32> to vector<8x8xbf16>
    %45 = vector.extract_strided_slice %30 {offsets = [0, 0], sizes = [8, 8], strides = [1, 1]} : vector<8x32xf32> to vector<8x8xf32>
    %46 = arith.truncf %45 : vector<8x8xf32> to vector<8x8xbf16>
    %cst_19 = arith.constant dense<0.000000e+00> : vector<8x8xf32>
    %47 = tpu.matmul %42, %44, %cst_19 {dimension_numbers = #tpu.dot_dimension_numbers<[1], [1], [0], [0], [0, 0, 1, 0], [], []>} : vector<8x8xbf16>, vector<8x8xbf16>, vector<8x8xf32> -> vector<8x8xf32>
    %48 = arith.mulf %47, %36 : vector<8x8xf32>
    %49 = arith.addf %48, %40 : vector<8x8xf32>
    %cst_20 = arith.constant dense<0xFF800000> : vector<8xf32>
    %50 = vector.multi_reduction <maximumf>, %49, %cst_20 [1] : vector<8x8xf32> to vector<8xf32>
    %51 = vector.shape_cast %50 : vector<8xf32> to vector<8x1xf32>
    %52 = vector.broadcast %51 : vector<8x1xf32> to vector<8x8xf32>
    %53 = arith.subf %49, %52 : vector<8x8xf32>
    %54 = math.exp %53 : vector<8x8xf32>
    %cst_21 = arith.constant dense<0.000000e+00> : vector<8xf32>
    %55 = vector.multi_reduction <add>, %54, %cst_21 [1] : vector<8x8xf32> to vector<8xf32>
    %56 = vector.shape_cast %55 : vector<8xf32> to vector<8x1xf32>
    %57 = tpu.reciprocal %56 {approx = true} : vector<8x1xf32> -> vector<8x1xf32>
    %58 = vector.broadcast %57 : vector<8x1xf32> to vector<8x8xf32>
    %59 = arith.mulf %54, %58 : vector<8x8xf32>
    %60 = arith.truncf %59 : vector<8x8xf32> to vector<8x8xbf16>
    %cst_22 = arith.constant dense<0.000000e+00> : vector<8x8xf32>
    %61 = tpu.matmul %60, %46, %cst_22 {dimension_numbers = #tpu.dot_dimension_numbers<[1], [0], [0], [1], [0, 0, 1, 1], [], []>} : vector<8x8xbf16>, vector<8x8xbf16>, vector<8x8xf32> -> vector<8x8xf32>
    %c0_23 = arith.constant 0 : index
    %c0_24 = arith.constant 0 : index
    %62 = vector.load %arg16[%c0_23, %c0_24] : memref<8x32xf32, #tpu.memory_space<vmem>>, vector<8x8xf32>
    tpu.vector_store %arg16[%c0_23, %c0_24], %61 {strides = array<i32>} : memref<8x32xf32, #tpu.memory_space<vmem>>, vector<8x8xf32>,
    %63 = vector.extract_strided_slice %28 {offsets = [0, 8], sizes = [8, 8], strides = [1, 1]} : vector<8x32xf32> to vector<8x8xf32>
    %64 = arith.truncf %63 : vector<8x8xf32> to vector<8x8xbf16>
    %65 = vector.extract_strided_slice %29 {offsets = [0, 8], sizes = [8, 8], strides = [1, 1]} : vector<8x32xf32> to vector<8x8xf32>
    %66 = arith.truncf %65 : vector<8x8xf32> to vector<8x8xbf16>
    %67 = vector.extract_strided_slice %30 {offsets = [0, 8], sizes = [8, 8], strides = [1, 1]} : vector<8x32xf32> to vector<8x8xf32>
    %68 = arith.truncf %67 : vector<8x8xf32> to vector<8x8xbf16>
    %cst_25 = arith.constant dense<0.000000e+00> : vector<8x8xf32>
    %69 = tpu.matmul %64, %66, %cst_25 {dimension_numbers = #tpu.dot_dimension_numbers<[1], [1], [0], [0], [0, 0, 1, 0], [], []>} : vector<8x8xbf16>, vector<8x8xbf16>, vector<8x8xf32> -> vector<8x8xf32>
    %70 = arith.mulf %69, %36 : vector<8x8xf32>
    %71 = arith.addf %70, %40 : vector<8x8xf32>
    %cst_26 = arith.constant dense<0xFF800000> : vector<8xf32>
    %72 = vector.multi_reduction <maximumf>, %71, %cst_26 [1] : vector<8x8xf32> to vector<8xf32>
    %73 = vector.shape_cast %72 : vector<8xf32> to vector<8x1xf32>
    %74 = vector.broadcast %73 : vector<8x1xf32> to vector<8x8xf32>
    %75 = arith.subf %71, %74 : vector<8x8xf32>
    %76 = math.exp %75 : vector<8x8xf32>
    %cst_27 = arith.constant dense<0.000000e+00> : vector<8xf32>
    %77 = vector.multi_reduction <add>, %76, %cst_27 [1] : vector<8x8xf32> to vector<8xf32>
    %78 = vector.shape_cast %77 : vector<8xf32> to vector<8x1xf32>
    %79 = tpu.reciprocal %78 {approx = true} : vector<8x1xf32> -> vector<8x1xf32>
    %80 = vector.broadcast %79 : vector<8x1xf32> to vector<8x8xf32>
    %81 = arith.mulf %76, %80 : vector<8x8xf32>
    %82 = arith.truncf %81 : vector<8x8xf32> to vector<8x8xbf16>
    %cst_28 = arith.constant dense<0.000000e+00> : vector<8x8xf32>
    %83 = tpu.matmul %82, %68, %cst_28 {dimension_numbers = #tpu.dot_dimension_numbers<[1], [0], [0], [1], [0, 0, 1, 1], [], []>} : vector<8x8xbf16>, vector<8x8xbf16>, vector<8x8xf32> -> vector<8x8xf32>
    %c0_29 = arith.constant 0 : index
    %c8 = arith.constant 8 : index
    %84 = vector.load %arg16[%c0_29, %c8] : memref<8x32xf32, #tpu.memory_space<vmem>>, vector<8x8xf32>
    tpu.vector_store %arg16[%c0_29, %c8], %83 {strides = array<i32>} : memref<8x32xf32, #tpu.memory_space<vmem>>, vector<8x8xf32>,
    %85 = vector.extract_strided_slice %28 {offsets = [0, 16], sizes = [8, 8], strides = [1, 1]} : vector<8x32xf32> to vector<8x8xf32>
    %86 = arith.truncf %85 : vector<8x8xf32> to vector<8x8xbf16>
    %87 = vector.extract_strided_slice %29 {offsets = [0, 16], sizes = [8, 8], strides = [1, 1]} : vector<8x32xf32> to vector<8x8xf32>
    %88 = arith.truncf %87 : vector<8x8xf32> to vector<8x8xbf16>
    %89 = vector.extract_strided_slice %30 {offsets = [0, 16], sizes = [8, 8], strides = [1, 1]} : vector<8x32xf32> to vector<8x8xf32>
    %90 = arith.truncf %89 : vector<8x8xf32> to vector<8x8xbf16>
    %cst_30 = arith.constant dense<0.000000e+00> : vector<8x8xf32>
    %91 = tpu.matmul %86, %88, %cst_30 {dimension_numbers = #tpu.dot_dimension_numbers<[1], [1], [0], [0], [0, 0, 1, 0], [], []>} : vector<8x8xbf16>, vector<8x8xbf16>, vector<8x8xf32> -> vector<8x8xf32>
    %92 = arith.mulf %91, %36 : vector<8x8xf32>
    %93 = arith.addf %92, %40 : vector<8x8xf32>
    %cst_31 = arith.constant dense<0xFF800000> : vector<8xf32>
    %94 = vector.multi_reduction <maximumf>, %93, %cst_31 [1] : vector<8x8xf32> to vector<8xf32>
    %95 = vector.shape_cast %94 : vector<8xf32> to vector<8x1xf32>
    %96 = vector.broadcast %95 : vector<8x1xf32> to vector<8x8xf32>
    %97 = arith.subf %93, %96 : vector<8x8xf32>
    %98 = math.exp %97 : vector<8x8xf32>
    %cst_32 = arith.constant dense<0.000000e+00> : vector<8xf32>
    %99 = vector.multi_reduction <add>, %98, %cst_32 [1] : vector<8x8xf32> to vector<8xf32>
    %100 = vector.shape_cast %99 : vector<8xf32> to vector<8x1xf32>
    %101 = tpu.reciprocal %100 {approx = true} : vector<8x1xf32> -> vector<8x1xf32>
    %102 = vector.broadcast %101 : vector<8x1xf32> to vector<8x8xf32>
    %103 = arith.mulf %98, %102 : vector<8x8xf32>
    %104 = arith.truncf %103 : vector<8x8xf32> to vector<8x8xbf16>
    %cst_33 = arith.constant dense<0.000000e+00> : vector<8x8xf32>
    %105 = tpu.matmul %104, %90, %cst_33 {dimension_numbers = #tpu.dot_dimension_numbers<[1], [0], [0], [1], [0, 0, 1, 1], [], []>} : vector<8x8xbf16>, vector<8x8xbf16>, vector<8x8xf32> -> vector<8x8xf32>
    %c0_34 = arith.constant 0 : index
    %c16 = arith.constant 16 : index
    %106 = vector.load %arg16[%c0_34, %c16] : memref<8x32xf32, #tpu.memory_space<vmem>>, vector<8x8xf32>
    tpu.vector_store %arg16[%c0_34, %c16], %105 {strides = array<i32>} : memref<8x32xf32, #tpu.memory_space<vmem>>, vector<8x8xf32>,
    %107 = vector.extract_strided_slice %28 {offsets = [0, 24], sizes = [8, 8], strides = [1, 1]} : vector<8x32xf32> to vector<8x8xf32>
    %108 = arith.truncf %107 : vector<8x8xf32> to vector<8x8xbf16>
    %109 = vector.extract_strided_slice %29 {offsets = [0, 24], sizes = [8, 8], strides = [1, 1]} : vector<8x32xf32> to vector<8x8xf32>
    %110 = arith.truncf %109 : vector<8x8xf32> to vector<8x8xbf16>
    %111 = vector.extract_strided_slice %30 {offsets = [0, 24], sizes = [8, 8], strides = [1, 1]} : vector<8x32xf32> to vector<8x8xf32>
    %112 = arith.truncf %111 : vector<8x8xf32> to vector<8x8xbf16>
    %cst_35 = arith.constant dense<0.000000e+00> : vector<8x8xf32>
    %113 = tpu.matmul %108, %110, %cst_35 {dimension_numbers = #tpu.dot_dimension_numbers<[1], [1], [0], [0], [0, 0, 1, 0], [], []>} : vector<8x8xbf16>, vector<8x8xbf16>, vector<8x8xf32> -> vector<8x8xf32>
    %114 = arith.mulf %113, %36 : vector<8x8xf32>
    %115 = arith.addf %114, %40 : vector<8x8xf32>
    %cst_36 = arith.constant dense<0xFF800000> : vector<8xf32>
    %116 = vector.multi_reduction <maximumf>, %115, %cst_36 [1] : vector<8x8xf32> to vector<8xf32>
    %117 = vector.shape_cast %116 : vector<8xf32> to vector<8x1xf32>
    %118 = vector.broadcast %117 : vector<8x1xf32> to vector<8x8xf32>
    %119 = arith.subf %115, %118 : vector<8x8xf32>
    %120 = math.exp %119 : vector<8x8xf32>
    %cst_37 = arith.constant dense<0.000000e+00> : vector<8xf32>
    %121 = vector.multi_reduction <add>, %120, %cst_37 [1] : vector<8x8xf32> to vector<8xf32>
    %122 = vector.shape_cast %121 : vector<8xf32> to vector<8x1xf32>
    %123 = tpu.reciprocal %122 {approx = true} : vector<8x1xf32> -> vector<8x1xf32>
    %124 = vector.broadcast %123 : vector<8x1xf32> to vector<8x8xf32>
    %125 = arith.mulf %120, %124 : vector<8x8xf32>
    %126 = arith.truncf %125 : vector<8x8xf32> to vector<8x8xbf16>
    %cst_38 = arith.constant dense<0.000000e+00> : vector<8x8xf32>
    %127 = tpu.matmul %126, %112, %cst_38 {dimension_numbers = #tpu.dot_dimension_numbers<[1], [0], [0], [1], [0, 0, 1, 1], [], []>} : vector<8x8xbf16>, vector<8x8xbf16>, vector<8x8xf32> -> vector<8x8xf32>
    %c0_39 = arith.constant 0 : index
    %c24 = arith.constant 24 : index
    %128 = vector.load %arg16[%c0_39, %c24] : memref<8x32xf32, #tpu.memory_space<vmem>>, vector<8x8xf32>
    tpu.vector_store %arg16[%c0_39, %c24], %127 {strides = array<i32>} : memref<8x32xf32, #tpu.memory_space<vmem>>, vector<8x8xf32>,
    %c0_40 = arith.constant 0 : index
    %c0_41 = arith.constant 0 : index
    %129 = vector.load %arg16[%c0_40, %c0_41] : memref<8x32xf32, #tpu.memory_space<vmem>>, vector<8x32xf32>
    %130 = arith.truncf %129 : vector<8x32xf32> to vector<8x32xbf16>
    %c0_42 = arith.constant 0 : index
    %c0_43 = arith.constant 0 : index
    %131 = vector.load %arg7[%c0_42, %c0_43] : memref<32x32xbf16, #tpu.memory_space<vmem>>, vector<32x32xbf16>
    %cst_44 = arith.constant dense<0.000000e+00> : vector<8x32xf32>
    %132 = tpu.matmul %130, %131, %cst_44 {dimension_numbers = #tpu.dot_dimension_numbers<[1], [0], [0], [1], [0, 0, 1, 1], [], []>} : vector<8x32xbf16>, vector<32x32xbf16>, vector<8x32xf32> -> vector<8x32xf32>
    %c0_45 = arith.constant 0 : index
    %c0_46 = arith.constant 0 : index
    %133 = vector.load %arg8[%c0_45, %c0_46] : memref<1x32xf32, #tpu.memory_space<vmem>>, vector<1x32xf32>
    %134 = vector.broadcast %133 : vector<1x32xf32> to vector<8x32xf32>
    %135 = arith.addf %132, %134 : vector<8x32xf32>
    %136 = arith.addf %0, %135 : vector<8x32xf32>
    %c0_47 = arith.constant 0 : index
    %c0_48 = arith.constant 0 : index
    %137 = vector.load %arg9[%c0_47, %c0_48] : memref<1x32xf32, #tpu.memory_space<vmem>>, vector<1x32xf32>
    %c0_49 = arith.constant 0 : index
    %c0_50 = arith.constant 0 : index
    %138 = vector.load %arg10[%c0_49, %c0_50] : memref<1x32xf32, #tpu.memory_space<vmem>>, vector<1x32xf32>
    %cst_51 = arith.constant dense<0.000000e+00> : vector<8xf32>
    %139 = vector.multi_reduction <add>, %136, %cst_51 [1] : vector<8x32xf32> to vector<8xf32>
    %140 = vector.shape_cast %139 : vector<8xf32> to vector<8x1xf32>
    %cst_52 = arith.constant 3.200000e+01 : f32
    %141 = vector.broadcast %cst_52 : f32 to vector<8x1xf32>
    %142 = arith.divf %140, %141 : vector<8x1xf32>
    %143 = arith.mulf %136, %136 : vector<8x32xf32>
    %cst_53 = arith.constant dense<0.000000e+00> : vector<8xf32>
    %144 = vector.multi_reduction <add>, %143, %cst_53 [1] : vector<8x32xf32> to vector<8xf32>
    %145 = vector.shape_cast %144 : vector<8xf32> to vector<8x1xf32>
    %cst_54 = arith.constant 3.200000e+01 : f32
    %146 = vector.broadcast %cst_54 : f32 to vector<8x1xf32>
    %147 = arith.divf %145, %146 : vector<8x1xf32>
    %148 = arith.mulf %142, %142 : vector<8x1xf32>
    %149 = arith.subf %147, %148 : vector<8x1xf32>
    %150 = vector.broadcast %142 : vector<8x1xf32> to vector<8x32xf32>
    %151 = arith.subf %136, %150 : vector<8x32xf32>
    %cst_55 = arith.constant 9.99999974E-6 : f32
    %152 = vector.broadcast %cst_55 : f32 to vector<8x1xf32>
    %153 = arith.addf %149, %152 : vector<8x1xf32>
    %154 = math.rsqrt %153 : vector<8x1xf32>
    %155 = vector.broadcast %154 : vector<8x1xf32> to vector<8x32xf32>
    %156 = arith.mulf %151, %155 : vector<8x32xf32>
    %157 = vector.broadcast %137 : vector<1x32xf32> to vector<8x32xf32>
    %158 = arith.mulf %156, %157 : vector<8x32xf32>
    %159 = vector.broadcast %138 : vector<1x32xf32> to vector<8x32xf32>
    %160 = arith.addf %158, %159 : vector<8x32xf32>
    %161 = arith.truncf %160 : vector<8x32xf32> to vector<8x32xbf16>
    %c0_56 = arith.constant 0 : index
    %c0_57 = arith.constant 0 : index
    %162 = vector.load %arg11[%c0_56, %c0_57] : memref<32x128xbf16, #tpu.memory_space<vmem>>, vector<32x128xbf16>
    %cst_58 = arith.constant dense<0.000000e+00> : vector<8x128xf32>
    %163 = tpu.matmul %161, %162, %cst_58 {dimension_numbers = #tpu.dot_dimension_numbers<[1], [0], [0], [1], [0, 0, 1, 1], [], []>} : vector<8x32xbf16>, vector<32x128xbf16>, vector<8x128xf32> -> vector<8x128xf32>
    %c0_59 = arith.constant 0 : index
    %c0_60 = arith.constant 0 : index
    %164 = vector.load %arg12[%c0_59, %c0_60] : memref<1x128xf32, #tpu.memory_space<vmem>>, vector<1x128xf32>
    %165 = vector.broadcast %164 : vector<1x128xf32> to vector<8x128xf32>
    %166 = arith.addf %163, %165 : vector<8x128xf32>
    %167 = arith.mulf %166, %166 : vector<8x128xf32>
    %168 = arith.mulf %166, %167 : vector<8x128xf32>
    %cst_61 = arith.constant 4.471500e-02 : f32
    %169 = vector.broadcast %cst_61 : f32 to vector<8x128xf32>
    %170 = arith.mulf %169, %168 : vector<8x128xf32>
    %171 = arith.addf %166, %170 : vector<8x128xf32>
    %cst_62 = arith.constant 0.797884583 : f32
    %172 = vector.broadcast %cst_62 : f32 to vector<8x128xf32>
    %173 = arith.mulf %172, %171 : vector<8x128xf32>
    %174 = math.tanh %173 : vector<8x128xf32>
    %cst_63 = arith.constant 1.000000e+00 : f32
    %175 = vector.broadcast %cst_63 : f32 to vector<8x128xf32>
    %176 = arith.addf %175, %174 : vector<8x128xf32>
    %cst_64 = arith.constant 5.000000e-01 : f32
    %177 = vector.broadcast %cst_64 : f32 to vector<8x128xf32>
    %178 = arith.mulf %177, %176 : vector<8x128xf32>
    %179 = arith.mulf %166, %178 : vector<8x128xf32>
    %180 = arith.truncf %179 : vector<8x128xf32> to vector<8x128xbf16>
    %c0_65 = arith.constant 0 : index
    %c0_66 = arith.constant 0 : index
    %181 = vector.load %arg13[%c0_65, %c0_66] : memref<128x32xbf16, #tpu.memory_space<vmem>>, vector<128x32xbf16>
    %cst_67 = arith.constant dense<0.000000e+00> : vector<8x32xf32>
    %182 = tpu.matmul %180, %181, %cst_67 {dimension_numbers = #tpu.dot_dimension_numbers<[1], [0], [0], [1], [0, 0, 1, 1], [], []>} : vector<8x128xbf16>, vector<128x32xbf16>, vector<8x32xf32> -> vector<8x32xf32>
    %c0_68 = arith.constant 0 : index
    %c0_69 = arith.constant 0 : index
    %183 = vector.load %arg14[%c0_68, %c0_69] : memref<1x32xf32, #tpu.memory_space<vmem>>, vector<1x32xf32>
    %184 = vector.broadcast %183 : vector<1x32xf32> to vector<8x32xf32>
    %185 = arith.addf %182, %184 : vector<8x32xf32>
    %186 = arith.addf %136, %185 : vector<8x32xf32>
    %c0_70 = arith.constant 0 : index
    %c0_71 = arith.constant 0 : index
    %187 = vector.load %arg15[%c0_70, %c0_71] : memref<8x32xf32, #tpu.memory_space<vmem>>, vector<8x32xf32>
    tpu.vector_store %arg15[%c0_70, %c0_71], %186 {strides = array<i32>} : memref<8x32xf32, #tpu.memory_space<vmem>>, vector<8x32xf32>,
    return
  }
  func.func @transform_0(%arg0: i32) -> (i32, i32) {
    %c0_i32 = arith.constant 0 : i32
    %c0_i32_0 = arith.constant 0 : i32
    return %arg0, %c0_i32 : i32, i32
  }
  func.func @transform_1(%arg0: i32) -> (i32, i32) {
    %c0_i32 = arith.constant 0 : i32
    %c0_i32_0 = arith.constant 0 : i32
    return %arg0, %c0_i32 : i32, i32
  }
  func.func @transform_2(%arg0: i32) -> (i32, i32, i32) {
    %c0_i32 = arith.constant 0 : i32
    %c0_i32_0 = arith.constant 0 : i32
    %c0_i32_1 = arith.constant 0 : i32
    return %arg0, %c0_i32, %c0_i32_0 : i32, i32, i32
  }
  func.func @transform_3(%arg0: i32) -> (i32, i32) {
    %c0_i32 = arith.constant 0 : i32
    %c0_i32_0 = arith.constant 0 : i32
    %c0_i32_1 = arith.constant 0 : i32
    return %c0_i32, %c0_i32_0 : i32, i32
  }
  func.func @transform_4(%arg0: i32) -> (i32, i32) {
    %c0_i32 = arith.constant 0 : i32
    %c0_i32_0 = arith.constant 0 : i32
    %c0_i32_1 = arith.constant 0 : i32
    return %c0_i32, %c0_i32_0 : i32, i32
  }
  func.func @transform_5(%arg0: i32) -> (i32, i32) {
    %c0_i32 = arith.constant 0 : i32
    %c0_i32_0 = arith.constant 0 : i32
    %c0_i32_1 = arith.constant 0 : i32
    return %c0_i32, %c0_i32_0 : i32, i32
  }
  func.func @transform_6(%arg0: i32) -> (i32, i32) {
    %c0_i32 = arith.constant 0 : i32
    %c0_i32_0 = arith.constant 0 : i32
    %c0_i32_1 = arith.constant 0 : i32
    return %c0_i32, %c0_i32_0 : i32, i32
  }
  func.func @transform_7(%arg0: i32) -> (i32, i32) {
    %c0_i32 = arith.constant 0 : i32
    %c0_i32_0 = arith.constant 0 : i32
    %c0_i32_1 = arith.constant 0 : i32
    return %c0_i32, %c0_i32_0 : i32, i32
  }
  func.func @transform_8(%arg0: i32) -> (i32, i32) {
    %c0_i32 = arith.constant 0 : i32
    %c0_i32_0 = arith.constant 0 : i32
    %c0_i32_1 = arith.constant 0 : i32
    return %c0_i32, %c0_i32_0 : i32, i32
  }
  func.func @transform_9(%arg0: i32) -> (i32, i32) {
    %c0_i32 = arith.constant 0 : i32
    %c0_i32_0 = arith.constant 0 : i32
    %c0_i32_1 = arith.constant 0 : i32
    return %c0_i32, %c0_i32_0 : i32, i32
  }
  func.func @transform_10(%arg0: i32) -> (i32, i32) {
    %c0_i32 = arith.constant 0 : i32
    %c0_i32_0 = arith.constant 0 : i32
    %c0_i32_1 = arith.constant 0 : i32
    return %c0_i32, %c0_i32_0 : i32, i32
  }
  func.func @transform_11(%arg0: i32) -> (i32, i32) {
    %c0_i32 = arith.constant 0 : i32
    %c0_i32_0 = arith.constant 0 : i32
    %c0_i32_1 = arith.constant 0 : i32
    return %c0_i32, %c0_i32_0 : i32, i32
  }
  func.func @transform_12(%arg0: i32) -> (i32, i32) {
    %c0_i32 = arith.constant 0 : i32
    %c0_i32_0 = arith.constant 0 : i32
    %c0_i32_1 = arith.constant 0 : i32
    return %c0_i32, %c0_i32_0 : i32, i32
  }
  func.func @transform_13(%arg0: i32) -> (i32, i32) {
    %c0_i32 = arith.constant 0 : i32
    %c0_i32_0 = arith.constant 0 : i32
    %c0_i32_1 = arith.constant 0 : i32
    return %c0_i32, %c0_i32_0 : i32, i32
  }
  func.func @transform_14(%arg0: i32) -> (i32, i32) {
    %c0_i32 = arith.constant 0 : i32
    %c0_i32_0 = arith.constant 0 : i32
    return %arg0, %c0_i32 : i32, i32
  }
}

</mosaic_0001>

<bundles_post_ra>
// kernel: tpu_custom_call.1
= control target key start
LH: loop header
LB: loop body
LE: loop exit
PB: predicated region body
PF: predicated region fallthrough
CT: control target
= control target key end

     0   :  { %s2161_s0 = inlined_call_operand.vmem [shape: f32[16,32], index: 0, kind: input, shape index: {}]   ;;  %s2162_s1 = inlined_call_operand.vmem [shape: f32[16,1], index: 1, kind: input, shape index: {}]   ;;  %s2163_s2 = inlined_call_operand.vmem [shape: f32[2,1,8], index: 2, kind: input, shape index: {}]   ;;  %s2164_s3 = inlined_call_operand.vmem [shape: f32[1,32], index: 3, kind: input, shape index: {}]   ;;  %s2165_s4 = inlined_call_operand.vmem [shape: f32[1,32], index: 4, kind: input, shape index: {}]   ;;  %s2166_s5 = inlined_call_operand.vmem [shape: bf16[32,96], index: 5, kind: input, shape index: {}]   ;;  %s2167_s6 = inlined_call_operand.vmem [shape: bf16[32,32], index: 6, kind: input, shape index: {}]   ;;  %s2168_s7 = inlined_call_operand.vmem [shape: f32[1,32], index: 7, kind: input, shape index: {}]   ;;  %s2169_s8 = inlined_call_operand.vmem [shape: f32[1,32], index: 8, kind: input, shape index: {}]   ;;  %s2170_s9 = inlined_call_operand.vmem [shape: f32[1,32], index: 9, kind: input, shape index: {}]   ;;  %s2171_s10 = inlined_call_operand.vmem [shape: bf16[32,128], index: 10, kind: input, shape index: {}]   ;;  %s2172_s11 = inlined_call_operand.vmem [shape: f32[1,128], index: 11, kind: input, shape index: {}]   ;;  %s2173_s12 = inlined_call_operand.vmem [shape: bf16[128,32], index: 12, kind: input, shape index: {}]   ;;  %s2174_s13 = inlined_call_operand.vmem [shape: f32[1,32], index: 13, kind: input, shape index: {}]   ;;  %s2175_s14 = inlined_call_operand.hbm [shape: f32[16,32], index: 14, kind: output, shape index: {}]  }
   0x1   :  { %2177 = sst [smem:[#allocation6_spill]] %s2161_s0 }
   0x2   :  { %2178 = sst [smem:[#allocation7_spill]] %s2162_s1 }
   0x3   :  { %2179 = sst [smem:[#allocation8_spill]] %s2164_s3 }
   0x4   :  { %2180 = sst [smem:[#allocation9_spill]] %s2165_s4 }
   0x5   :  { %19 = vsyncpa [#allocation4], 0 }
   0x6   :  { %21 = vsyncpa [#allocation4 + $0x1], 0  ;;  %s1878_s29 = smov 0   ;;  %s1880_s30 = smov 0  }
   0x7   :  { %s1882_s15 = smov 0   ;;  %s1884_s16 = smov 0  }
   0x8 LB: > { %s1899_s17 = sadd.s32 4294967295, %s1783_s16   ;;  %s1458_s18 = sadd.s32 4294967294, %s1783_s16   ;;  %s1783_s16 = sphi %s1884_s16, %s2191_s16   ;;  %s1779_s15 = sphi %s1882_s15, %s2190_s15   ;;  %s1775_s30 = sphi %s1880_s30, %s2189_s30   ;;  %s1771_s29 = sphi %s1878_s29, %s2188_s29  }
   0x9   : > { %s1903_s19 = sadd.s32 1, %s1783_s16   ;;  %s343_s20 = sadd.s32 1, %s1779_s15 }
   0xa   : > { %s340_s21 = ssub.s32 %s1783_s16, %s1903_s19  ;;  %p353_p0 = scmp.ne.s32.totalorder %s1779_s15, %s1775_s30 }
   0xb   : > { %p341_p1 = scmp.eq.s32.totalorder %s340_s21, 0  ;;  %p354_p2 = scmp.eq.s32.totalorder %s1899_s17, 1 }
   0xc   : > { %p359_p3 = scmp.ne.s32.totalorder %s1775_s30, %s1771_s29  ;;  %p360_p4 = scmp.eq.s32.totalorder %s1458_s18, 1 }
   0xd   : > { %s1914_s22 = scalar_select %p341_p1, %s1779_s15, %s343_s20  }
   0xe   : > { %p1916_p5 = por %p354_p2, %p353_p0  ;;  %p1920_p6 = por %p360_p4, %p359_p3 }
   0xf   : > { %p1461_p7 = scmp.ge.s32.totalorder %s1783_s16, 1  ;;  %p431_p8 = scmp.lt.s32.totalorder %s1783_s16, 3 }
  0x11   : > { %p432_p9 = pnand %p1461_p7, %p431_p8 }
  0x12   : > { %p483_p10 = scmp.lt.s32.totalorder (!%p432_p9), %s1899_s17, 1  ;;  %s2183_s0 = sld [smem:[#allocation6_spill]] (!%p432_p9) }
  0x13   : > { %435 = sbr.rel (%p432_p9) target bundleno = 2208 (0x8a0), region = 76  ;;  %s2184_s3 = sld [smem:[#allocation8_spill]] (!%p432_p9) }
  0x14   : > { %s2185_s4 = sld [smem:[#allocation9_spill]] (!%p432_p9)  ;;  %s1787_s28 = smov (!%p432_p9), 120  }
  0x15   : > { %s1789_s20 = smov (!%p432_p9), 88   ;;  %s1790_s21 = smov (!%p432_p9), 80  }
  0x16   : > { %s1791_s27 = smov (!%p432_p9), 112   ;;  %s2187_s1 = sld [smem:[#allocation7_spill]] (!%p432_p9) }
  0x18   : > { %s1928_s25 = scalar_select %p483_p10, %s1899_s17, 1  ;;  %vm498_vm0 = vcmask 261120   ;;  %v1687_v4 = vld [vmem:[%s2166_s5 + $0x8] sm:$0xff]   ;;  %v1785_v5 = vmov 0.0   ;;  %vm1786_vm1 = vmmov 0   ;;  %v1688_v6 = vld [vmem:[%s2166_s5] sm:$0xff]  }
  0x19   : > { %1537 = vmatprep.subr.bf16.mxu0 %v1785_v5  ;;  %1541 = vmatprep.mubr.msk.bf16.mxu0 %vm1786_vm1, %v1785_v5  ;;  %v1465_v16 = vld [vmem:[%s2184_s3] ss:$0 sm:$0xff]  ;;  %v1793_v27 = vmov 0   ;;  %vm609_vm2 = vcmask 64512   ;;  %vm675_vm3 = vcmask 1043456   ;;  %vm836_vm4 = vcmask 130112  }
  0x1a   : > { %s2176_s26 = sshll.u32 %s1928_s25, 3  ;;  %1538 = vmatpush3.bf16.msra.mxu0 %v1687_v4  ;;  %1557 = vmatprep.subr.bf16.mxu1 %v1785_v5  ;;  %v1466_v18 = vld [vmem:[%s2185_s4] ss:$0 sm:$0xff]  ;;  %s1794_s4 = smov 104   ;;  %vm954_vm5 = vcmask 195712   ;;  %vm1072_vm6 = vcmask 261312  }
  0x1b   : > { %s486_s18 = scalar_lea.vmem %s2183_s0, %s2176_s26  ;;  %1539 = vmatprep.subr.bf16.mxu0 %v1785_v5  ;;  %1559 = vmatprep.mubr.msk.bf16.mxu1 %vm1786_vm1, %v1785_v5  ;;  %s1792_s26 = smov 72  }
  0x1c   : > { %v1936_v0 = vld [vmem:[%s486_s18] sm:$0xff]  ;;  %s1788_s18 = smov 96   ;;  %1686 = vset.pattern.permute.xlu0 %v1793_v27  ;;  %1685 = vset.pattern.permute.xlu1 %v1793_v27 }
  0x1d   : > { %v499_v1 = vsel %vm498_vm0, %v1936_v0, 0.0  ;;  %v504_v2 = vmul.f32 %v1936_v0, %v1936_v0 }
  0x1e   : > { %500 = vadd.xlane.f32.xlu0 %v499_v1  ;;  %1540 = vmatpush3.bf16.msra.mxu0 %v1688_v6 }
  0x1f   : > { %v505_v3 = vsel %vm498_vm0, %v504_v2, 0.0  ;;  %1545 = vmatprep.subr.bf16.mxu0 %v1785_v5 }
  0x22   : > { %506 = vadd.xlane.f32.xlu0 %v505_v3 }
  0xa7   : > { %v501_v7 = vpop.xlane.xlu0 %500 }
  0xa8   : > { %v503_v8 = vmul.f32 0.03125, %v501_v7 }
  0xaa   : > { %v509_v10 = vmul.f32 %v503_v8, %v503_v8  ;;  %v511_v14 = vsub.f32 %v1936_v0, %v503_v8 }
  0xab   : > { %v507_v9 = vpop.xlane.xlu0 %506 }
  0xac   : > { %v508_v11 = vmul.f32 0.03125, %v507_v9 }
  0xae   : > { %v510_v12 = vsub.f32 %v508_v11, %v509_v10 }
  0xb0   : > { %v512_v13 = vadd.f32 1e-05, %v510_v12 }
  0xb2   : > { %1701 = vrsqrt.f32 %v512_v13 }
  0xbf   : > { %v1702_v15 = vpop.eup %1701 }
  0xc0   : > { %v514_v17 = vmul.f32 %v1702_v15, %v511_v14 }
  0xc2   : > { %v521_v19 = vmul.f32 %v1465_v16, %v514_v17 }
  0xc4   : > { %v528_v20 = vadd.f32 %v1466_v18, %v521_v19 }
  0xc6   : > { %v529_v21 = vpack.c.bf16 %v528_v20, %v528_v20 }
  0xc8   : > { %1542 = vmatmul.mubr.msk.bf16.vlgmr.msra.gmra.mxu0 %vm498_vm0, %v529_v21 }
  0xc9   : > { %1547 = vmatprep.mubr.msk.bf16.mxu0 %vm1786_vm1, %v1785_v5 }
 0x188   : > { %v583_v22 = vpop.f32.mrf.mxu0 }
 0x189   : > { %v1967_v23 = vpack.c.bf16 %v583_v22, %v583_v22 }
 0x18a   : > { %v1543_v24 = vpop.f32.mrf.mxu0 }
 0x18b   : > { %720 = vrot.lane.b32.xlu0 %v1967_v23, %s1787_s28  ;;  %607 = vrot.lane.b32.xlu1 %v1967_v23, %s1788_s18  ;;  %s2186_s28 = sshll.u32 %s1928_s25, 3 }
 0x18c   : > { %v586_v25 = vpop.f32.mrf.mxu0  ;;  %s490_s3 = scalar_lea.vmem %s2187_s1, %s2186_s28 }
 0x18d   : > { %v589_v28 = vld [vmem:[%s490_s3] sm:$0xff] }
 0x18e   : > { %v1544_v26 = vpop.f32.mrf.mxu0 }
 0x18f   : > { %722 = vrot.lane.b32.xlu1 %v1967_v23, %s1789_s20  ;;  %s1797_s20 = smov 40  }
 0x193   : > { %840 = vrot.lane.b32.xlu1 %v1967_v23, %s1790_s21  ;;  %s1798_s21 = smov 48  }
 0x197   : > { %838 = vrot.lane.b32.xlu1 %v1967_v23, %s1791_s27  ;;  %s1799_s27 = smov 8  }
 0x19b   : > { %958 = vrot.lane.b32.xlu1 %v1967_v23, %s1792_s26  ;;  %s1796_s26 = smov 64  }
 0x19f   : > { %956 = vrot.lane.b32.xlu1 %v1967_v23, %s1794_s4  ;;  %s493_s4 = scalar_lea.vmem %s2163_s2, %s1928_s25  ;;  %s1795_s25 = smov 56  }
 0x1a0   : > { %v1470_v40 = vld [vmem:[%s493_s4] ss:$0 sm:$0xff]  ;;  %s1800_s4 = smov 16  }
 0x1a3   : > { %593 = vperm.xlu1 %1685, %v589_v28  }
 0x1fd   : > { %v608_v29 = vpop.permute.xlu1 %607  ;;  %v721_v34 = vpop.permute.xlu0 %720 }
 0x1fe   : > { %v614_v30 = vsel %vm609_vm2, %v608_v29, 0 }
 0x1ff   : > { %1546 = vmatpush3.bf16.xpose.msra.mxu0 %v614_v30 }
 0x200   : > { %1551 = vmatprep.subr.bf16.mxu0 %v1785_v5 }
 0x201   : > { %v723_v31 = vpop.permute.xlu1 %722 }
 0x202   : > { %v728_v32 = vsel %vm609_vm2, %v723_v31, 0 }
 0x203   : > { %1558 = vmatpush3.bf16.xpose.msra.mxu1 %v728_v32 }
 0x204   : > { %1569 = vmatprep.subr.bf16.mxu1 %v1785_v5 }
 0x205   : > { %v841_v33 = vpop.permute.xlu1 %840 }
 0x206   : > { %1548 = vmatmul.mubr.msk.bf16.vlgmr.msra.gmra.mxu0 %vm609_vm2, %v1967_v23  ;;  %v846_v36 = vsel %vm609_vm2, %v841_v33, 0 }
 0x207   : > { %1553 = vmatprep.mubr.msk.bf16.mxu0 %vm1786_vm1, %v1785_v5 }
 0x209   : > { %v839_v35 = vpop.permute.xlu1 %838 }
 0x20a   : > { %1560 = vmatmul.mubr.msk.bf16.vlgmr.msra.gmra.mxu1 %vm609_vm2, %v721_v34 }
 0x20b   : > { %1570 = vmatpush3.bf16.xpose.msra.mxu1 %v846_v36  ;;  %1571 = vmatprep.mubr.msk.bf16.mxu1 %vm1786_vm1, %v1785_v5 }
 0x20c   : > { %1581 = vmatprep.subr.bf16.mxu1 %v1785_v5 }
 0x20d   : > { %v959_v37 = vpop.permute.xlu1 %958 }
 0x20e   : > { %v964_v38 = vsel %vm609_vm2, %v959_v37, 0 }
 0x211   : > { %v957_v39 = vpop.permute.xlu1 %956 }
 0x212   : > { %1572 = vmatmul.mubr.msk.bf16.vlgmr.msra.gmra.mxu1 %vm609_vm2, %v839_v35 }
 0x213   : > { %1582 = vmatpush3.bf16.xpose.msra.mxu1 %v964_v38  ;;  %1583 = vmatprep.mubr.msk.bf16.mxu1 %vm1786_vm1, %v1785_v5 }
 0x214   : > { %1593 = vmatprep.subr.bf16.mxu1 %v1785_v5 }
 0x21a   : > { %1584 = vmatmul.mubr.msk.bf16.vlgmr.msra.gmra.mxu1 %vm609_vm2, %v957_v39 }
 0x21b   : > { %1597 = vmatprep.mubr.msk.bf16.mxu1 %vm1786_vm1, %v1785_v5 }
 0x21e   : > { %v594_v41 = vpop.permute.xlu1 %593 }
 0x21f   : > { %v602_v42 = vmul.f32 %v1470_v40, %v594_v41 }
 0x221   : > { %v1471_v43 = vadd.f32 -1.0, %v602_v42 }
 0x223   : > { %v604_v44 = vmul.f32 1e+30, %v1471_v43 }
 0x2c6   : > { %v650_v45 = vpop.f32.mrf.mxu0 }
 0x2c7   : > { %v656_v46 = vmul.f32 %v650_v45, %v602_v42 }
 0x2c8   : > { %v1549_v47 = vpop.f32.mrf.mxu0 }
 0x2c9   : > { %v657_v48 = vadd.f32 %v656_v46, %v604_v44 }
 0x2ca   : > { %v653_v49 = vpop.f32.mrf.mxu0  ;;  %v764_v50 = vpop.f32.mrf.mxu1 }
 0x2cb   : > { %v770_v51 = vmul.f32 %v764_v50, %v602_v42  ;;  %v658_v52 = vsel %vm609_vm2, %v657_v48, -inf }
 0x2cc   : > { %v1561_v53 = vpop.f32.mrf.mxu1  ;;  %659 = vmax.xlane.f32.xlu1 %v658_v52  ;;  %v1550_v54 = vpop.f32.mrf.mxu0 }
 0x2cd   : > { %v771_v55 = vadd.f32 %v770_v51, %v604_v44 }
 0x2ce   : > { %v767_v56 = vpop.f32.mrf.mxu1 }
 0x2cf   : > { %v772_v57 = vsel %vm609_vm2, %v771_v55, -inf }
 0x2d0   : > { %v1562_v58 = vpop.f32.mrf.mxu1  ;;  %773 = vmax.xlane.f32.xlu0 %v772_v57 }
 0x2d2   : > { %v882_v59 = vpop.f32.mrf.mxu1 }
 0x2d3   : > { %v888_v60 = vmul.f32 %v882_v59, %v602_v42 }
 0x2d4   : > { %v1573_v61 = vpop.f32.mrf.mxu1 }
 0x2d5   : > { %v889_v62 = vadd.f32 %v888_v60, %v604_v44 }
 0x2d6   : > { %v885_v63 = vpop.f32.mrf.mxu1 }
 0x2d7   : > { %v890_v1 = vsel %vm609_vm2, %v889_v62, -inf  ;;  %v1689_v63 = vld [vmem:[%s2167_s6 + $0x8] sm:$0xff]  }
 0x2d8   : > { %v1574_v2 = vpop.f32.mrf.mxu1  ;;  %891 = vmax.xlane.f32.xlu0 %v890_v1  ;;  %1594 = vmatpush3.bf16.msra.mxu1 %v1689_v63 }
 0x2d9   : > { %v1690_v2 = vld [vmem:[%s2167_s6] sm:$0xff]   ;;  %1595 = vmatprep.subr.bf16.mxu1 %v1785_v5 }
 0x2da   : > { %v1000_v3 = vpop.f32.mrf.mxu1 }
 0x2db   : > { %v1006_v4 = vmul.f32 %v1000_v3, %v602_v42 }
 0x2dc   : > { %v1585_v6 = vpop.f32.mrf.mxu1  ;;  %1596 = vmatpush3.bf16.msra.mxu1 %v1690_v2  ;;  %v1490_v2 = vld [vmem:[%s2174_s13] ss:$0 sm:$0xff] }
 0x2dd   : > { %v1007_v7 = vadd.f32 %v1006_v4, %v604_v44  ;;  %1609 = vmatprep.subr.bf16.mxu1 %v1785_v5 }
 0x2de   : > { %v1003_v8 = vpop.f32.mrf.mxu1 }
 0x2df   : > { %v1008_v9 = vsel %vm609_vm2, %v1007_v7, -inf }
 0x2e0   : > { %v1586_v10 = vpop.f32.mrf.mxu1  ;;  %1009 = vmax.xlane.f32.xlu1 %v1008_v9 }
 0x355   : > { %v660_v11 = vpop.xlane.xlu1 %659 }
 0x356   : > { %v661_v12 = vsub.f32 %v657_v48, %v660_v11 }
 0x358   : > { %v662_v13 = vmul.f32 1.442695, %v661_v12 }
 0x359   : > { %v774_v14 = vpop.xlane.xlu0 %773 }
 0x35a   : > { %1703 = vpow2.f32 %v662_v13  ;;  %v775_v15 = vsub.f32 %v771_v55, %v774_v14 }
 0x35c   : > { %v776_v16 = vmul.f32 1.442695, %v775_v15 }
 0x35e   : > { %1705 = vpow2.f32 %v776_v16  ;;  %v1480_v16 = vld [vmem:[%s2168_s7] ss:$0 sm:$0xff] }
 0x361   : > { %v892_v17 = vpop.xlane.xlu0 %891 }
 0x362   : > { %v893_v18 = vsub.f32 %v889_v62, %v892_v17 }
 0x364   : > { %v894_v19 = vmul.f32 1.442695, %v893_v18 }
 0x366   : > { %1707 = vpow2.f32 %v894_v19 }
 0x367   : > { %v1704_v20 = vpop.eup %1703 }
 0x368   : > { %v664_v21 = vsel %vm609_vm2, %v1704_v20, 0.0 }
 0x369   : > { %665 = vadd.xlane.f32.xlu0 %v664_v21  ;;  %v1010_v27 = vpop.xlane.xlu1 %1009 }
 0x36a   : > { %v1011_v28 = vsub.f32 %v1007_v7, %v1010_v27  ;;  %v1691_v27 = vld [vmem:[%s2171_s10 + $0x8] sm:$0xff]  }
 0x36b   : > { %v1706_v22 = vpop.eup %1705 }
 0x36c   : > { %v778_v24 = vsel %vm609_vm2, %v1706_v22, 0.0  ;;  %v1012_v29 = vmul.f32 1.442695, %v1011_v28 }
 0x36d   : > { %779 = vadd.xlane.f32.xlu1 %v778_v24 }
 0x36e   : > { %1709 = vpow2.f32 %v1012_v29 }
 0x373   : > { %v1708_v25 = vpop.eup %1707 }
 0x374   : > { %v896_v26 = vsel %vm609_vm2, %v1708_v25, 0.0 }
 0x375   : > { %897 = vadd.xlane.f32.xlu0 %v896_v26 }
 0x37b   : > { %v1710_v30 = vpop.eup %1709 }
 0x37c   : > { %v1014_v31 = vsel %vm609_vm2, %v1710_v30, 0.0 }
 0x37e   : > { %784 = vrot.lane.b32.xlu1 %v1967_v23, %s1795_s25  ;;  %s1801_s25 = smov 24  }
 0x38b   : > { %670 = vrot.lane.b32.xlu0 %v1967_v23, %s1796_s26  ;;  %s1802_s26 = smov [#allocation3]  }
 0x38f   : > { %1020 = vrot.lane.b32.xlu0 %v1967_v23, %s1797_s20  ;;  %s1727_s20 = sshll.u32 %s1802_s26, 4  ;;  %s1728_s20 = int_to_ptr.vmem [resolvable:$false] %s1727_s20 }
 0x3a2   : > { %1015 = vadd.xlane.f32.xlu1 %v1014_v31 }
 0x3b3   : > { %902 = vrot.lane.b32.xlu1 %v1967_v23, %s1798_s21  ;;  %s1500_s21 = sshll.u32 %s1899_s17, 7 }
 0x3b4   : > { %s2119_s3 = scalar_lea.hbm %s2175_s14, %s1500_s21  ;;  %s1729_s21 = scalar_lea.vmem %s1728_s20, 256 }
 0x3f2   : > { %v666_v32 = vpop.xlane.xlu0 %665 }
 0x3f3   : > { %1711 = vrcp.f32 %v666_v32 }
 0x3f6   : > { %v780_v33 = vpop.xlane.xlu1 %779 }
 0x3f7   : > { %1713 = vrcp.f32 %v780_v33 }
 0x3fa   : > { %v785_v39 = vpop.permute.xlu1 %784 }
 0x3fb   : > { %v790_v42 = vsel %vm675_vm3, %v785_v39, 0  ;;  %v1485_v39 = vld [vmem:[%s2170_s9] ss:$0 sm:$0xff] }
 0x3fe   : > { %v898_v34 = vpop.xlane.xlu0 %897 }
 0x3ff   : > { %1715 = vrcp.f32 %v898_v34 }
 0x400   : > { %v1712_v35 = vpop.eup %1711 }
 0x401   : > { %v668_v36 = vmul.f32 %v1712_v35, %v1704_v20 }
 0x402   : > { %v671_v37 = vpop.permute.xlu0 %670 }
 0x403   : > { %v677_v38 = vsel %vm675_vm3, %v671_v37, 0  ;;  %v669_v40 = vpack.c.bf16 %v668_v36, %v668_v36  ;;  %v1484_v37 = vld [vmem:[%s2169_s8] ss:$0 sm:$0xff] }
 0x404   : > { %1552 = vmatpush3.bf16.msra.mxu0 %v677_v38  ;;  %v1714_v41 = vpop.eup %1713 }
 0x405   : > { %1563 = vmatprep.subr.bf16.mxu0 %v1785_v5  ;;  %v782_v23 = vmul.f32 %v1714_v41, %v1706_v22 }
 0x406   : > { %v1021_v49 = vpop.permute.xlu0 %1020 }
 0x407   : > { %1554 = vmatmul.mubr.msk.bf16.vlgmr.msra.gmra.mxu0 %vm609_vm2, %v669_v40  ;;  %v783_v43 = vpack.c.bf16 %v782_v23, %v782_v23  ;;  %v1026_v51 = vsel %vm675_vm3, %v1021_v49, 0  ;;  %v1693_v23 = vld [vmem:[%s2173_s12 + $0x38] sm:$0xff]   ;;  %v1700_v49 = vld [vmem:[%s2173_s12] sm:$0xff]  }
 0x408   : > { %1564 = vmatpush3.bf16.msra.mxu0 %v790_v42  ;;  %1565 = vmatprep.mubr.msk.bf16.mxu0 %vm1786_vm1, %v1785_v5 }
 0x409   : > { %1575 = vmatprep.subr.bf16.mxu0 %v1785_v5 }
 0x40c   : > { %v1716_v44 = vpop.eup %1715 }
 0x40d   : > { %v900_v46 = vmul.f32 %v1716_v44, %v1708_v25  ;;  %v1695_v44 = vld [vmem:[%s2173_s12 + $0x28] sm:$0xff]  }
 0x40f   : > { %1566 = vmatmul.mubr.msk.bf16.vlgmr.msra.gmra.mxu0 %vm609_vm2, %v783_v43  ;;  %v901_v50 = vpack.c.bf16 %v900_v46, %v900_v46  ;;  %v1694_v43 = vld [vmem:[%s2173_s12 + $0x30] sm:$0xff]   ;;  %v1697_v46 = vld [vmem:[%s2173_s12 + $0x18] sm:$0xff]  }
 0x410   : > { %1577 = vmatprep.mubr.msk.bf16.mxu0 %vm1786_vm1, %v1785_v5 }
 0x42b   : > { %v1016_v45 = vpop.xlane.xlu1 %1015 }
 0x42c   : > { %1717 = vrcp.f32 %v1016_v45  ;;  %v1696_v45 = vld [vmem:[%s2173_s12 + $0x20] sm:$0xff]  }
 0x42f   : > { %v903_v47 = vpop.permute.xlu1 %902 }
 0x430   : > { %v908_v48 = vsel %vm675_vm3, %v903_v47, 0  ;;  %v1698_v47 = vld [vmem:[%s2173_s12 + $0x10] sm:$0xff]  }
 0x431   : > { %1576 = vmatpush3.bf16.msra.mxu0 %v908_v48  ;;  %v1699_v48 = vld [vmem:[%s2173_s12 + $0x8] sm:$0xff]  }
 0x432   : > { %1587 = vmatprep.subr.bf16.mxu0 %v1785_v5 }
 0x434   : > { %1578 = vmatmul.mubr.msk.bf16.vlgmr.msra.gmra.mxu0 %vm609_vm2, %v901_v50  ;;  %v1486_v50 = vld [vmem:[%s2172_s11] ss:$0 sm:$0xff] }
 0x435   : > { %1588 = vmatpush3.bf16.msra.mxu0 %v1026_v51  ;;  %1589 = vmatprep.mubr.msk.bf16.mxu0 %vm1786_vm1, %v1785_v5 }
 0x436   : > { %1601 = vmatprep.subr.bf16.mxu0 %v1785_v5 }
 0x439   : > { %v1718_v52 = vpop.eup %1717 }
 0x43a   : > { %v1018_v53 = vmul.f32 %v1718_v52, %v1710_v30 }
 0x43c   : > { %v1019_v54 = vpack.c.bf16 %v1018_v53, %v1018_v53 }
 0x43e   : > { %1590 = vmatmul.mubr.msk.bf16.vlgmr.msra.gmra.mxu0 %vm609_vm2, %v1019_v54 }
 0x43f   : > { %1605 = vmatprep.mubr.msk.bf16.mxu0 %vm1786_vm1, %v1785_v5  ;;  %1602 = vmatpush3.bf16.msra.mxu0 %v1691_v27 }
 0x440   : > { %1603 = vmatprep.subr.bf16.mxu0 %v1785_v5 }
 0x4c7   : > { %v713_v55 = vpop.f32.mrf.mxu0 }
 0x4c8   : > { %719 = vst.msk [vmem:[#allocation2] sm:$0xff] %vm609_vm2, %v713_v55 }
 0x4c9   : > { %v1555_v56 = vpop.f32.mrf.mxu0 }
 0x4cb   : > { %v716_v57 = vpop.f32.mrf.mxu0 }
 0x4cd   : > { %v1556_v58 = vpop.f32.mrf.mxu0 }
 0x4cf   : > { %v826_v59 = vpop.f32.mrf.mxu0 }
 0x4d0   : > { %833 = vrot.lane.b32.xlu1 %v826_v59, %s1799_s27 }
 0x4d1   : > { %v1567_v60 = vpop.f32.mrf.mxu0 }
 0x4d3   : > { %v829_v61 = vpop.f32.mrf.mxu0 }
 0x4d5   : > { %v1568_v62 = vpop.f32.mrf.mxu0 }
 0x4f4   : > { %v944_v1 = vpop.f32.mrf.mxu0 }
 0x4f5   : > { %951 = vrot.lane.b32.xlu0 %v944_v1, %s1800_s4  ;;  %s480_s4 = sand.u32 1, %s1775_s30  }
 0x4f6   : > { %v1579_v3 = vpop.f32.mrf.mxu0  ;;  %s1365_s17 = scalar_lea.sflag [#allocation4], %s480_s4 }
 0x4f8   : > { %v947_v4 = vpop.f32.mrf.mxu0 }
 0x4fa   : > { %v1580_v6 = vpop.f32.mrf.mxu0 }
 0x4fe   : > { %v1062_v7 = vpop.f32.mrf.mxu0 }
 0x4ff   : > { %1069 = vrot.lane.b32.xlu1 %v1062_v7, %s1801_s25  ;;  %s1462_s25 = sshll.u32 %s480_s4, 3 }
 0x500   : > { %v1591_v8 = vpop.f32.mrf.mxu0  ;;  %s482_s27 = scalar_lea.vmem [#allocation3], %s1462_s25 }
 0x501   : > { %s1378_s28 = sshll.u32 %s482_s27, 4  ;;  %s2121_s28 = int_to_ptr.vmem [resolvable:$true] %s1378_s28 }
 0x502   : > { %v1065_v9 = vpop.f32.mrf.mxu0  ;;  %s1723_s25 = scalar_lea.vmem %s2121_s28, 128  ;;  %p1730_p0 = scmp.lt.s32.totalorder %s2121_s28, %s1728_s20 }
 0x503   : > { %p1724_p11 = scmp.ne.s32.totalorder %s2121_s28, %s1723_s25  ;;  %p1731_p1 = scmp.lt.s32.totalorder %s1729_s21, %s1723_s25 }
 0x504   : > { %v1592_v10 = vpop.f32.mrf.mxu0 }
 0x505   : > { %p1725_p12 = pnand %p1724_p11, %p1916_p5  ;;  %p1732_p2 = por %p1731_p1, %p1730_p0 }
 0x507   : > { %p1726_p13 = pneg %p1725_p12 }
 0x509   : > { %p1733_p3 = pnand %p1732_p2, %p1726_p13 }
 0x542   : > { %v834_v11 = vpop.permute.xlu1 %833 }
 0x543   : > { %837 = vst.msk [vmem:[#allocation2] sm:$0xff] %vm836_vm4, %v834_v11 }
 0x567   : > { %v952_v12 = vpop.permute.xlu0 %951 }
 0x568   : > { %955 = vst.msk [vmem:[#allocation2] sm:$0xff] %vm954_vm5, %v952_v12 }
 0x571   : > { %v1070_v13 = vpop.permute.xlu1 %1069 }
 0x572   : > { %1073 = vst.msk [vmem:[#allocation2] sm:$0xff] %vm1072_vm6, %v1070_v13 }
 0x579   : > { %v1074_v14 = vld [vmem:[#allocation2] sm:$0xff] }
 0x57a   : > { %v1075_v15 = vpack.c.bf16 %v1074_v14, %v1074_v14 }
 0x57c   : > { %1598 = vmatmul.mubr.msk.bf16.vlgmr.msra.gmra.mxu1 %vm498_vm0, %v1075_v15 }
 0x57d   : > { %1625 = vmatprep.mubr.msk.bf16.mxu1 %vm1786_vm1, %v1785_v5  ;;  %1610 = vmatpush3.bf16.msra.mxu1 %v1693_v23 }
 0x57e   : > { %1611 = vmatprep.subr.bf16.mxu1 %v1785_v5 }
 0x581   : > { %1612 = vmatpush3.bf16.msra.mxu1 %v1694_v43 }
 0x582   : > { %1613 = vmatprep.subr.bf16.mxu1 %v1785_v5 }
 0x585   : > { %1614 = vmatpush3.bf16.msra.mxu1 %v1695_v44 }
 0x586   : > { %1615 = vmatprep.subr.bf16.mxu1 %v1785_v5 }
 0x589   : > { %1616 = vmatpush3.bf16.msra.mxu1 %v1696_v45 }
 0x58a   : > { %1617 = vmatprep.subr.bf16.mxu1 %v1785_v5 }
 0x58d   : > { %1618 = vmatpush3.bf16.msra.mxu1 %v1697_v46 }
 0x58e   : > { %1619 = vmatprep.subr.bf16.mxu1 %v1785_v5 }
 0x591   : > { %1620 = vmatpush3.bf16.msra.mxu1 %v1698_v47 }
 0x592   : > { %1621 = vmatprep.subr.bf16.mxu1 %v1785_v5 }
 0x595   : > { %1622 = vmatpush3.bf16.msra.mxu1 %v1699_v48 }
 0x596   : > { %1623 = vmatprep.subr.bf16.mxu1 %v1785_v5 }
 0x599   : > { %1624 = vmatpush3.bf16.msra.mxu1 %v1700_v49 }
 0x63c   : > { %v1136_v17 = vpop.f32.mrf.mxu1 }
 0x63d   : > { %v1137_v18 = vadd.f32 %v1480_v16, %v1136_v17 }
 0x63e   : > { %v1599_v19 = vpop.f32.mrf.mxu1 }
 0x63f   : > { %v2054_v20 = vadd.f32 %v1137_v18, %v1936_v0  ;;  %v1692_v0 = vld [vmem:[%s2171_s10] sm:$0xff]  }
 0x640   : > { %v1139_v21 = vpop.f32.mrf.mxu1  ;;  %1604 = vmatpush3.bf16.msra.mxu0 %v1692_v0 }
 0x641   : > { %v1145_v22 = vsel %vm498_vm0, %v2054_v20, 0.0  ;;  %v1149_v24 = vmul.f32 %v2054_v20, %v2054_v20 }
 0x642   : > { %1146 = vadd.xlane.f32.xlu0 %v1145_v22  ;;  %v1600_v25 = vpop.f32.mrf.mxu1 }
 0x643   : > { %v1150_v26 = vsel %vm498_vm0, %v1149_v24, 0.0 }
 0x644   : > { %1151 = vadd.xlane.f32.xlu1 %v1150_v26 }
 0x6cb   : > { %v1147_v28 = vpop.xlane.xlu0 %1146 }
 0x6cc   : > { %v1148_v29 = vmul.f32 0.03125, %v1147_v28 }
 0x6cd   : > { %v1152_v30 = vpop.xlane.xlu1 %1151 }
 0x6ce   : > { %v1154_v31 = vmul.f32 %v1148_v29, %v1148_v29  ;;  %v1153_v32 = vmul.f32 0.03125, %v1152_v30  ;;  %v1156_v35 = vsub.f32 %v2054_v20, %v1148_v29 }
 0x6d0   : > { %v1155_v33 = vsub.f32 %v1153_v32, %v1154_v31 }
 0x6d2   : > { %v1157_v34 = vadd.f32 1e-05, %v1155_v33 }
 0x6d4   : > { %1719 = vrsqrt.f32 %v1157_v34 }
 0x6e1   : > { %v1720_v36 = vpop.eup %1719 }
 0x6e2   : > { %v1159_v38 = vmul.f32 %v1720_v36, %v1156_v35 }
 0x6e4   : > { %v1166_v40 = vmul.f32 %v1484_v37, %v1159_v38 }
 0x6e6   : > { %v1173_v41 = vadd.f32 %v1485_v39, %v1166_v40 }
 0x6e8   : > { %v1174_v42 = vpack.c.bf16 %v1173_v41, %v1173_v41 }
 0x6ea   : > { %1606 = vmatmul.mubr.msk.bf16.vlgmr.msra.gmra.mxu0 %vm498_vm0, %v1174_v42 }
 0x7aa   : > { %v1235_v51 = vpop.f32.mrf.mxu0 }
 0x7ab   : > { %v1236_v52 = vadd.f32 %v1486_v50, %v1235_v51 }
 0x7ac   : > { %v1607_v53 = vpop.f32.mrf.mxu0 }
 0x7ad   : > { %v1241_v54 = vmul.f32 %v1236_v52, %v1236_v52 }
 0x7ae   : > { %v1238_v55 = vpop.f32.mrf.mxu0 }
 0x7af   : > { %v1242_v56 = vmul.f32 %v1241_v54, %v1236_v52 }
 0x7b0   : > { %v1608_v57 = vpop.f32.mrf.mxu0 }
 0x7b1   : > { %v1243_v58 = vmul.f32 0.044715, %v1242_v56 }
 0x7b3   : > { %v1244_v59 = vadd.f32 %v1243_v58, %v1236_v52 }
 0x7b5   : > { %v1245_v60 = vmul.f32 0.7978846, %v1244_v59 }
 0x7b7   : > { %1721 = vtanh.f32 %v1245_v60 }
 0x7c4   : > { %v1722_v61 = vpop.eup %1721 }
 0x7c5   : > { %v1247_v5 = vadd.f32 1.0, %v1722_v61 }
 0x7c7   : > { %v1248_v62 = vmul.f32 0.5, %v1247_v5 }
 0x7c9   : > { %v1249_v63 = vmul.f32 %v1248_v62, %v1236_v52 }
 0x7cb   : > { %v1250_v1 = vpack.c.bf16 %v1249_v63, %v1249_v63 }
 0x7cd   : > { %1626 = vmatmul.mubr.bf16.vlgmr.msra.gmra.mxu1 %v1250_v1 }
 0x88d   : > { %v1356_v3 = vpop.f32.mrf.mxu1 }
 0x88e   : > { %v1357_v4 = vadd.f32 %v1490_v2, %v1356_v3 }
 0x88f   : > { %v1627_v6 = vpop.f32.mrf.mxu1 }
 0x890   : > { %v1362_v7 = vadd.f32 %v1357_v4, %v2054_v20 }
 0x891   : > { %v1359_v8 = vpop.f32.mrf.mxu1 }
 0x892   : > { %1363 = vst.msk [vmem:[%s482_s27] sm:$0xff] %vm498_vm0, %v1362_v7 }
 0x893   : > { %v1628_v9 = vpop.f32.mrf.mxu1 }
 0x894   : > { %1736 = shalt.err (!%p1733_p3)
}
 0x895   : > { %s1737_s27 = scalar_lea.hbm %s2119_s3, 128  ;;  %s1741_s0 = scalar_lea.hbm %s2175_s14, 256 }
 0x896   : > { %p1738_p4 = scmp.ne.s32.totalorder %s2119_s3, %s1737_s27  ;;  %p1742_p9 = scmp.lt.s32.totalorder %s2119_s3, %s2175_s14 }
 0x897   : > { %p1743_p10 = scmp.lt.s32.totalorder %s1741_s0, %s1737_s27 }
 0x898   : > { %p1739_p7 = pnand %p1738_p4, %p1916_p5 }
 0x899   : > { %p1744_p11 = por %p1743_p10, %p1742_p9 }
 0x89a   : > { %p1740_p8 = pneg %p1739_p7 }
 0x89c   : > { %p1745_p12 = pnand %p1744_p11, %p1740_p8 }
 0x89e   : > { %1748 = shalt.err (!%p1745_p12)
}
 0x89f   : > { %1629 = dma.vmem_to_hbm [thread:$0]  (%p1916_p5), %s2121_s28, 128, %s2119_s3, %s1365_s17  }
 0x8a0 PF: > { %p1635_p13 = scmp.ge.s32.totalorder %s1783_s16, 2  ;;  %s1390_s25 = sand.u32 1, %s1771_s29  }
 0x8a1   : > { %s1391_s1 = scalar_lea.sflag [#allocation4], %s1390_s25 }
 0x8a2   : > { %p1632_p0 = pnand %p1635_p13, %p1920_p6 }
 0x8a4   : > { %p1633_p1 = pneg %p1632_p0 }
 0x8a6   : > { %1766 = dma.done.wait (%p1633_p1), %s1391_s1, 128  }
 0x8a7   : > { %1768 = vsyncadd (%p1633_p1), %s1391_s1, 4294967168  ;;  %p24_p2 = scmp.ge.s32.totalorder %s1903_s19, 4   ;;  %s2188_s29 = smov %s1775_s30 }
 0x8a8   : > { %s2189_s30 = smov %s1779_s15  ;;  %s2190_s15 = smov %s1914_s22 }
 0x8a9   : > { %s2191_s16 = smov %s1903_s19  ;;  %26 = sbr.rel (!%p24_p2) target bundleno = 8 (0x8), region = 117 }
 0x8ae   :  { %1396 = vsyncpa [#allocation4], 1 }
 0x8af   :  { %1398 = vsyncpa [#allocation4 + $0x1], 1 }

// kernel: tpu_custom_call.1
= control target key start
LH: loop header
LB: loop body
LE: loop exit
PB: predicated region body
PF: predicated region fallthrough
CT: control target
= control target key end

     0   :  { %s2161_s0 = inlined_call_operand.vmem [shape: f32[16,32], index: 0, kind: input, shape index: {}]   ;;  %s2162_s1 = inlined_call_operand.vmem [shape: f32[16,1], index: 1, kind: input, shape index: {}]   ;;  %s2163_s2 = inlined_call_operand.vmem [shape: f32[2,1,8], index: 2, kind: input, shape index: {}]   ;;  %s2164_s3 = inlined_call_operand.vmem [shape: f32[1,32], index: 3, kind: input, shape index: {}]   ;;  %s2165_s4 = inlined_call_operand.vmem [shape: f32[1,32], index: 4, kind: input, shape index: {}]   ;;  %s2166_s5 = inlined_call_operand.vmem [shape: bf16[32,96], index: 5, kind: input, shape index: {}]   ;;  %s2167_s6 = inlined_call_operand.vmem [shape: bf16[32,32], index: 6, kind: input, shape index: {}]   ;;  %s2168_s7 = inlined_call_operand.vmem [shape: f32[1,32], index: 7, kind: input, shape index: {}]   ;;  %s2169_s8 = inlined_call_operand.vmem [shape: f32[1,32], index: 8, kind: input, shape index: {}]   ;;  %s2170_s9 = inlined_call_operand.vmem [shape: f32[1,32], index: 9, kind: input, shape index: {}]   ;;  %s2171_s10 = inlined_call_operand.vmem [shape: bf16[32,128], index: 10, kind: input, shape index: {}]   ;;  %s2172_s11 = inlined_call_operand.vmem [shape: f32[1,128], index: 11, kind: input, shape index: {}]   ;;  %s2173_s12 = inlined_call_operand.vmem [shape: bf16[128,32], index: 12, kind: input, shape index: {}]   ;;  %s2174_s13 = inlined_call_operand.vmem [shape: f32[1,32], index: 13, kind: input, shape index: {}]   ;;  %s2175_s14 = inlined_call_operand.hbm [shape: f32[16,32], index: 14, kind: output, shape index: {}]  }
   0x1   :  { %2177 = sst [smem:[#allocation6_spill]] %s2161_s0 }
   0x2   :  { %2178 = sst [smem:[#allocation7_spill]] %s2162_s1 }
   0x3   :  { %2179 = sst [smem:[#allocation8_spill]] %s2164_s3 }
   0x4   :  { %2180 = sst [smem:[#allocation9_spill]] %s2165_s4 }
   0x5   :  { %19 = vsyncpa [#allocation4], 0 }
   0x6   :  { %21 = vsyncpa [#allocation4 + $0x1], 0  ;;  %s1878_s29 = smov 0   ;;  %s1880_s30 = smov 0  }
   0x7   :  { %s1882_s15 = smov 0   ;;  %s1884_s16 = smov 0  }
   0x8 LB: > { %s1899_s17 = sadd.s32 4294967295, %s1783_s16   ;;  %s1458_s18 = sadd.s32 4294967294, %s1783_s16   ;;  %s1783_s16 = sphi %s1884_s16, %s2191_s16   ;;  %s1779_s15 = sphi %s1882_s15, %s2190_s15   ;;  %s1775_s30 = sphi %s1880_s30, %s2189_s30   ;;  %s1771_s29 = sphi %s1878_s29, %s2188_s29  }
   0x9   : > { %s1903_s19 = sadd.s32 1, %s1783_s16   ;;  %s343_s20 = sadd.s32 1, %s1779_s15 }
   0xa   : > { %s340_s21 = ssub.s32 %s1783_s16, %s1903_s19  ;;  %p353_p0 = scmp.ne.s32.totalorder %s1779_s15, %s1775_s30 }
   0xb   : > { %p341_p1 = scmp.eq.s32.totalorder %s340_s21, 0  ;;  %p354_p2 = scmp.eq.s32.totalorder %s1899_s17, 1 }
   0xc   : > { %p359_p3 = scmp.ne.s32.totalorder %s1775_s30, %s1771_s29  ;;  %p360_p4 = scmp.eq.s32.totalorder %s1458_s18, 1 }
   0xd   : > { %s1914_s22 = scalar_select %p341_p1, %s1779_s15, %s343_s20  }
   0xe   : > { %p1916_p5 = por %p354_p2, %p353_p0  ;;  %p1920_p6 = por %p360_p4, %p359_p3 }
   0xf   : > { %p1461_p7 = scmp.ge.s32.totalorder %s1783_s16, 1  ;;  %p431_p8 = scmp.lt.s32.totalorder %s1783_s16, 3 }
  0x11   : > { %p432_p9 = pnand %p1461_p7, %p431_p8 }
  0x12   : > { %p483_p10 = scmp.lt.s32.totalorder (!%p432_p9), %s1899_s17, 1  ;;  %s2183_s0 = sld [smem:[#allocation6_spill]] (!%p432_p9) }
  0x13   : > { %435 = sbr.rel (%p432_p9) target bundleno = 2208 (0x8a0), region = 76  ;;  %s2184_s3 = sld [smem:[#allocation8_spill]] (!%p432_p9) }
  0x14   : > { %s2185_s4 = sld [smem:[#allocation9_spill]] (!%p432_p9)  ;;  %s1787_s28 = smov (!%p432_p9), 120  }
  0x15   : > { %s1789_s20 = smov (!%p432_p9), 88   ;;  %s1790_s21 = smov (!%p432_p9), 80  }
  0x16   : > { %s1791_s27 = smov (!%p432_p9), 112   ;;  %s2187_s1 = sld [smem:[#allocation7_spill]] (!%p432_p9) }
  0x18   : > { %s1928_s25 = scalar_select %p483_p10, %s1899_s17, 1  ;;  %vm498_vm0 = vcmask 261120   ;;  %v1687_v4 = vld [vmem:[%s2166_s5 + $0x8] sm:$0xff]   ;;  %v1785_v5 = vmov 0.0   ;;  %vm1786_vm1 = vmmov 0   ;;  %v1688_v6 = vld [vmem:[%s2166_s5] sm:$0xff]  }
  0x19   : > { %1537 = vmatprep.subr.bf16.mxu0 %v1785_v5  ;;  %1541 = vmatprep.mubr.msk.bf16.mxu0 %vm1786_vm1, %v1785_v5  ;;  %v1465_v16 = vld [vmem:[%s2184_s3] ss:$0 sm:$0xff]  ;;  %v1793_v27 = vmov 0   ;;  %vm609_vm2 = vcmask 64512   ;;  %vm675_vm3 = vcmask 1043456   ;;  %vm836_vm4 = vcmask 130112  }
  0x1a   : > { %s2176_s26 = sshll.u32 %s1928_s25, 3  ;;  %1538 = vmatpush3.bf16.msra.mxu0 %v1687_v4  ;;  %1557 = vmatprep.subr.bf16.mxu1 %v1785_v5  ;;  %v1466_v18 = vld [vmem:[%s2185_s4] ss:$0 sm:$0xff]  ;;  %s1794_s4 = smov 104   ;;  %vm954_vm5 = vcmask 195712   ;;  %vm1072_vm6 = vcmask 261312  }
  0x1b   : > { %s486_s18 = scalar_lea.vmem %s2183_s0, %s2176_s26  ;;  %1539 = vmatprep.subr.bf16.mxu0 %v1785_v5  ;;  %1559 = vmatprep.mubr.msk.bf16.mxu1 %vm1786_vm1, %v1785_v5  ;;  %s1792_s26 = smov 72  }
  0x1c   : > { %v1936_v0 = vld [vmem:[%s486_s18] sm:$0xff]  ;;  %s1788_s18 = smov 96   ;;  %1686 = vset.pattern.permute.xlu0 %v1793_v27  ;;  %1685 = vset.pattern.permute.xlu1 %v1793_v27 }
  0x1d   : > { %v499_v1 = vsel %vm498_vm0, %v1936_v0, 0.0  ;;  %v504_v2 = vmul.f32 %v1936_v0, %v1936_v0 }
  0x1e   : > { %500 = vadd.xlane.f32.xlu0 %v499_v1  ;;  %1540 = vmatpush3.bf16.msra.mxu0 %v1688_v6 }
  0x1f   : > { %v505_v3 = vsel %vm498_vm0, %v504_v2, 0.0  ;;  %1545 = vmatprep.subr.bf16.mxu0 %v1785_v5 }
  0x22   : > { %506 = vadd.xlane.f32.xlu0 %v505_v3 }
  0xa7   : > { %v501_v7 = vpop.xlane.xlu0 %500 }
  0xa8   : > { %v503_v8 = vmul.f32 0.03125, %v501_v7 }
  0xaa   : > { %v509_v10 = vmul.f32 %v503_v8, %v503_v8  ;;  %v511_v14 = vsub.f32 %v1936_v0, %v503_v8 }
  0xab   : > { %v507_v9 = vpop.xlane.xlu0 %506 }
  0xac   : > { %v508_v11 = vmul.f32 0.03125, %v507_v9 }
  0xae   : > { %v510_v12 = vsub.f32 %v508_v11, %v509_v10 }
  0xb0   : > { %v512_v13 = vadd.f32 1e-05, %v510_v12 }
  0xb2   : > { %1701 = vrsqrt.f32 %v512_v13 }
  0xbf   : > { %v1702_v15 = vpop.eup %1701 }
  0xc0   : > { %v514_v17 = vmul.f32 %v1702_v15, %v511_v14 }
  0xc2   : > { %v521_v19 = vmul.f32 %v1465_v16, %v514_v17 }
  0xc4   : > { %v528_v20 = vadd.f32 %v1466_v18, %v521_v19 }
  0xc6   : > { %v529_v21 = vpack.c.bf16 %v528_v20, %v528_v20 }
  0xc8   : > { %1542 = vmatmul.mubr.msk.bf16.vlgmr.msra.gmra.mxu0 %vm498_vm0, %v529_v21 }
  0xc9   : > { %1547 = vmatprep.mubr.msk.bf16.mxu0 %vm1786_vm1, %v1785_v5 }
 0x188   : > { %v583_v22 = vpop.f32.mrf.mxu0 }
 0x189   : > { %v1967_v23 = vpack.c.bf16 %v583_v22, %v583_v22 }
 0x18a   : > { %v1543_v24 = vpop.f32.mrf.mxu0 }
 0x18b   : > { %720 = vrot.lane.b32.xlu0 %v1967_v23, %s1787_s28  ;;  %607 = vrot.lane.b32.xlu1 %v1967_v23, %s1788_s18  ;;  %s2186_s28 = sshll.u32 %s1928_s25, 3 }
 0x18c   : > { %v586_v25 = vpop.f32.mrf.mxu0  ;;  %s490_s3 = scalar_lea.vmem %s2187_s1, %s2186_s28 }
 0x18d   : > { %v589_v28 = vld [vmem:[%s490_s3] sm:$0xff] }
 0x18e   : > { %v1544_v26 = vpop.f32.mrf.mxu0 }
 0x18f   : > { %722 = vrot.lane.b32.xlu1 %v1967_v23, %s1789_s20  ;;  %s1797_s20 = smov 40  }
 0x193   : > { %840 = vrot.lane.b32.xlu1 %v1967_v23, %s1790_s21  ;;  %s1798_s21 = smov 48  }
 0x197   : > { %838 = vrot.lane.b32.xlu1 %v1967_v23, %s1791_s27  ;;  %s1799_s27 = smov 8  }
 0x19b   : > { %958 = vrot.lane.b32.xlu1 %v1967_v23, %s1792_s26  ;;  %s1796_s26 = smov 64  }
 0x19f   : > { %956 = vrot.lane.b32.xlu1 %v1967_v23, %s1794_s4  ;;  %s493_s4 = scalar_lea.vmem %s2163_s2, %s1928_s25  ;;  %s1795_s25 = smov 56  }
 0x1a0   : > { %v1470_v40 = vld [vmem:[%s493_s4] ss:$0 sm:$0xff]  ;;  %s1800_s4 = smov 16  }
 0x1a3   : > { %593 = vperm.xlu1 %1685, %v589_v28  }
 0x1fd   : > { %v608_v29 = vpop.permute.xlu1 %607  ;;  %v721_v34 = vpop.permute.xlu0 %720 }
 0x1fe   : > { %v614_v30 = vsel %vm609_vm2, %v608_v29, 0 }
 0x1ff   : > { %1546 = vmatpush3.bf16.xpose.msra.mxu0 %v614_v30 }
 0x200   : > { %1551 = vmatprep.subr.bf16.mxu0 %v1785_v5 }
 0x201   : > { %v723_v31 = vpop.permute.xlu1 %722 }
 0x202   : > { %v728_v32 = vsel %vm609_vm2, %v723_v31, 0 }
 0x203   : > { %1558 = vmatpush3.bf16.xpose.msra.mxu1 %v728_v32 }
 0x204   : > { %1569 = vmatprep.subr.bf16.mxu1 %v1785_v5 }
 0x205   : > { %v841_v33 = vpop.permute.xlu1 %840 }
 0x206   : > { %1548 = vmatmul.mubr.msk.bf16.vlgmr.msra.gmra.mxu0 %vm609_vm2, %v1967_v23  ;;  %v846_v36 = vsel %vm609_vm2, %v841_v33, 0 }
 0x207   : > { %1553 = vmatprep.mubr.msk.bf16.mxu0 %vm1786_vm1, %v1785_v5 }
 0x209   : > { %v839_v35 = vpop.permute.xlu1 %838 }
 0x20a   : > { %1560 = vmatmul.mubr.msk.bf16.vlgmr.msra.gmra.mxu1 %vm609_vm2, %v721_v34 }
 0x20b   : > { %1570 = vmatpush3.bf16.xpose.msra.mxu1 %v846_v36  ;;  %1571 = vmatprep.mubr.msk.bf16.mxu1 %vm1786_vm1, %v1785_v5 }
 0x20c   : > { %1581 = vmatprep.subr.bf16.mxu1 %v1785_v5 }
 0x20d   : > { %v959_v37 = vpop.permute.xlu1 %958 }
 0x20e   : > { %v964_v38 = vsel %vm609_vm2, %v959_v37, 0 }
 0x211   : > { %v957_v39 = vpop.permute.xlu1 %956 }
 0x212   : > { %1572 = vmatmul.mubr.msk.bf16.vlgmr.msra.gmra.mxu1 %vm609_vm2, %v839_v35 }
 0x213   : > { %1582 = vmatpush3.bf16.xpose.msra.mxu1 %v964_v38  ;;  %1583 = vmatprep.mubr.msk.bf16.mxu1 %vm1786_vm1, %v1785_v5 }
 0x214   : > { %1593 = vmatprep.subr.bf16.mxu1 %v1785_v5 }
 0x21a   : > { %1584 = vmatmul.mubr.msk.bf16.vlgmr.msra.gmra.mxu1 %vm609_vm2, %v957_v39 }
 0x21b   : > { %1597 = vmatprep.mubr.msk.bf16.mxu1 %vm1786_vm1, %v1785_v5 }
 0x21e   : > { %v594_v41 = vpop.permute.xlu1 %593 }
 0x21f   : > { %v602_v42 = vmul.f32 %v1470_v40, %v594_v41 }
 0x221   : > { %v1471_v43 = vadd.f32 -1.0, %v602_v42 }
 0x223   : > { %v604_v44 = vmul.f32 1e+30, %v1471_v43 }
 0x2c6   : > { %v650_v45 = vpop.f32.mrf.mxu0 }
 0x2c7   : > { %v656_v46 = vmul.f32 %v650_v45, %v602_v42 }
 0x2c8   : > { %v1549_v47 = vpop.f32.mrf.mxu0 }
 0x2c9   : > { %v657_v48 = vadd.f32 %v656_v46, %v604_v44 }
 0x2ca   : > { %v653_v49 = vpop.f32.mrf.mxu0  ;;  %v764_v50 = vpop.f32.mrf.mxu1 }
 0x2cb   : > { %v770_v51 = vmul.f32 %v764_v50, %v602_v42  ;;  %v658_v52 = vsel %vm609_vm2, %v657_v48, -inf }
 0x2cc   : > { %v1561_v53 = vpop.f32.mrf.mxu1  ;;  %659 = vmax.xlane.f32.xlu1 %v658_v52  ;;  %v1550_v54 = vpop.f32.mrf.mxu0 }
 0x2cd   : > { %v771_v55 = vadd.f32 %v770_v51, %v604_v44 }
 0x2ce   : > { %v767_v56 = vpop.f32.mrf.mxu1 }
 0x2cf   : > { %v772_v57 = vsel %vm609_vm2, %v771_v55, -inf }
 0x2d0   : > { %v1562_v58 = vpop.f32.mrf.mxu1  ;;  %773 = vmax.xlane.f32.xlu0 %v772_v57 }
 0x2d2   : > { %v882_v59 = vpop.f32.mrf.mxu1 }
 0x2d3   : > { %v888_v60 = vmul.f32 %v882_v59, %v602_v42 }
 0x2d4   : > { %v1573_v61 = vpop.f32.mrf.mxu1 }
 0x2d5   : > { %v889_v62 = vadd.f32 %v888_v60, %v604_v44 }
 0x2d6   : > { %v885_v63 = vpop.f32.mrf.mxu1 }
 0x2d7   : > { %v890_v1 = vsel %vm609_vm2, %v889_v62, -inf  ;;  %v1689_v63 = vld [vmem:[%s2167_s6 + $0x8] sm:$0xff]  }
 0x2d8   : > { %v1574_v2 = vpop.f32.mrf.mxu1  ;;  %891 = vmax.xlane.f32.xlu0 %v890_v1  ;;  %1594 = vmatpush3.bf16.msra.mxu1 %v1689_v63 }
 0x2d9   : > { %v1690_v2 = vld [vmem:[%s2167_s6] sm:$0xff]   ;;  %1595 = vmatprep.subr.bf16.mxu1 %v1785_v5 }
 0x2da   : > { %v1000_v3 = vpop.f32.mrf.mxu1 }
 0x2db   : > { %v1006_v4 = vmul.f32 %v1000_v3, %v602_v42 }
 0x2dc   : > { %v1585_v6 = vpop.f32.mrf.mxu1  ;;  %1596 = vmatpush3.bf16.msra.mxu1 %v1690_v2  ;;  %v1490_v2 = vld [vmem:[%s2174_s13] ss:$0 sm:$0xff] }
 0x2dd   : > { %v1007_v7 = vadd.f32 %v1006_v4, %v604_v44  ;;  %1609 = vmatprep.subr.bf16.mxu1 %v1785_v5 }
 0x2de   : > { %v1003_v8 = vpop.f32.mrf.mxu1 }
 0x2df   : > { %v1008_v9 = vsel %vm609_vm2, %v1007_v7, -inf }
 0x2e0   : > { %v1586_v10 = vpop.f32.mrf.mxu1  ;;  %1009 = vmax.xlane.f32.xlu1 %v1008_v9 }
 0x355   : > { %v660_v11 = vpop.xlane.xlu1 %659 }
 0x356   : > { %v661_v12 = vsub.f32 %v657_v48, %v660_v11 }
 0x358   : > { %v662_v13 = vmul.f32 1.442695, %v661_v12 }
 0x359   : > { %v774_v14 = vpop.xlane.xlu0 %773 }
 0x35a   : > { %1703 = vpow2.f32 %v662_v13  ;;  %v775_v15 = vsub.f32 %v771_v55, %v774_v14 }
 0x35c   : > { %v776_v16 = vmul.f32 1.442695, %v775_v15 }
 0x35e   : > { %1705 = vpow2.f32 %v776_v16  ;;  %v1480_v16 = vld [vmem:[%s2168_s7] ss:$0 sm:$0xff] }
 0x361   : > { %v892_v17 = vpop.xlane.xlu0 %891 }
 0x362   : > { %v893_v18 = vsub.f32 %v889_v62, %v892_v17 }
 0x364   : > { %v894_v19 = vmul.f32 1.442695, %v893_v18 }
 0x366   : > { %1707 = vpow2.f32 %v894_v19 }
 0x367   : > { %v1704_v20 = vpop.eup %1703 }
 0x368   : > { %v664_v21 = vsel %vm609_vm2, %v1704_v20, 0.0 }
 0x369   : > { %665 = vadd.xlane.f32.xlu0 %v664_v21  ;;  %v1010_v27 = vpop.xlane.xlu1 %1009 }
 0x36a   : > { %v1011_v28 = vsub.f32 %v1007_v7, %v1010_v27  ;;  %v1691_v27 = vld [vmem:[%s2171_s10 + $0x8] sm:$0xff]  }
 0x36b   : > { %v1706_v22 = vpop.eup %1705 }
 0x36c   : > { %v778_v24 = vsel %vm609_vm2, %v1706_v22, 0.0  ;;  %v1012_v29 = vmul.f32 1.442695, %v1011_v28 }
 0x36d   : > { %779 = vadd.xlane.f32.xlu1 %v778_v24 }
 0x36e   : > { %1709 = vpow2.f32 %v1012_v29 }
 0x373   : > { %v1708_v25 = vpop.eup %1707 }
 0x374   : > { %v896_v26 = vsel %vm609_vm2, %v1708_v25, 0.0 }
 0x375   : > { %897 = vadd.xlane.f32.xlu0 %v896_v26 }
 0x37b   : > { %v1710_v30 = vpop.eup %1709 }
 0x37c   : > { %v1014_v31 = vsel %vm609_vm2, %v1710_v30, 0.0 }
 0x37e   : > { %784 = vrot.lane.b32.xlu1 %v1967_v23, %s1795_s25  ;;  %s1801_s25 = smov 24  }
 0x38b   : > { %670 = vrot.lane.b32.xlu0 %v1967_v23, %s1796_s26  ;;  %s1802_s26 = smov [#allocation3]  }
 0x38f   : > { %1020 = vrot.lane.b32.xlu0 %v1967_v23, %s1797_s20  ;;  %s1727_s20 = sshll.u32 %s1802_s26, 4  ;;  %s1728_s20 = int_to_ptr.vmem [resolvable:$false] %s1727_s20 }
 0x3a2   : > { %1015 = vadd.xlane.f32.xlu1 %v1014_v31 }
 0x3b3   : > { %902 = vrot.lane.b32.xlu1 %v1967_v23, %s1798_s21  ;;  %s1500_s21 = sshll.u32 %s1899_s17, 7 }
 0x3b4   : > { %s2119_s3 = scalar_lea.hbm %s2175_s14, %s1500_s21  ;;  %s1729_s21 = scalar_lea.vmem %s1728_s20, 256 }
 0x3f2   : > { %v666_v32 = vpop.xlane.xlu0 %665 }
 0x3f3   : > { %1711 = vrcp.f32 %v666_v32 }
 0x3f6   : > { %v780_v33 = vpop.xlane.xlu1 %779 }
 0x3f7   : > { %1713 = vrcp.f32 %v780_v33 }
 0x3fa   : > { %v785_v39 = vpop.permute.xlu1 %784 }
 0x3fb   : > { %v790_v42 = vsel %vm675_vm3, %v785_v39, 0  ;;  %v1485_v39 = vld [vmem:[%s2170_s9] ss:$0 sm:$0xff] }
 0x3fe   : > { %v898_v34 = vpop.xlane.xlu0 %897 }
 0x3ff   : > { %1715 = vrcp.f32 %v898_v34 }
 0x400   : > { %v1712_v35 = vpop.eup %1711 }
 0x401   : > { %v668_v36 = vmul.f32 %v1712_v35, %v1704_v20 }
 0x402   : > { %v671_v37 = vpop.permute.xlu0 %670 }
 0x403   : > { %v677_v38 = vsel %vm675_vm3, %v671_v37, 0  ;;  %v669_v40 = vpack.c.bf16 %v668_v36, %v668_v36  ;;  %v1484_v37 = vld [vmem:[%s2169_s8] ss:$0 sm:$0xff] }
 0x404   : > { %1552 = vmatpush3.bf16.msra.mxu0 %v677_v38  ;;  %v1714_v41 = vpop.eup %1713 }
 0x405   : > { %1563 = vmatprep.subr.bf16.mxu0 %v1785_v5  ;;  %v782_v23 = vmul.f32 %v1714_v41, %v1706_v22 }
 0x406   : > { %v1021_v49 = vpop.permute.xlu0 %1020 }
 0x407   : > { %1554 = vmatmul.mubr.msk.bf16.vlgmr.msra.gmra.mxu0 %vm609_vm2, %v669_v40  ;;  %v783_v43 = vpack.c.bf16 %v782_v23, %v782_v23  ;;  %v1026_v51 = vsel %vm675_vm3, %v1021_v49, 0  ;;  %v1693_v23 = vld [vmem:[%s2173_s12 + $0x38] sm:$0xff]   ;;  %v1700_v49 = vld [vmem:[%s2173_s12] sm:$0xff]  }
 0x408   : > { %1564 = vmatpush3.bf16.msra.mxu0 %v790_v42  ;;  %1565 = vmatprep.mubr.msk.bf16.mxu0 %vm1786_vm1, %v1785_v5 }
 0x409   : > { %1575 = vmatprep.subr.bf16.mxu0 %v1785_v5 }
 0x40c   : > { %v1716_v44 = vpop.eup %1715 }
 0x40d   : > { %v900_v46 = vmul.f32 %v1716_v44, %v1708_v25  ;;  %v1695_v44 = vld [vmem:[%s2173_s12 + $0x28] sm:$0xff]  }
 0x40f   : > { %1566 = vmatmul.mubr.msk.bf16.vlgmr.msra.gmra.mxu0 %vm609_vm2, %v783_v43  ;;  %v901_v50 = vpack.c.bf16 %v900_v46, %v900_v46  ;;  %v1694_v43 = vld [vmem:[%s2173_s12 + $0x30] sm:$0xff]   ;;  %v1697_v46 = vld [vmem:[%s2173_s12 + $0x18] sm:$0xff]  }
 0x410   : > { %1577 = vmatprep.mubr.msk.bf16.mxu0 %vm1786_vm1, %v1785_v5 }
 0x42b   : > { %v1016_v45 = vpop.xlane.xlu1 %1015 }
 0x42c   : > { %1717 = vrcp.f32 %v1016_v45  ;;  %v1696_v45 = vld [vmem:[%s2173_s12 + $0x20] sm:$0xff]  }
 0x42f   : > { %v903_v47 = vpop.permute.xlu1 %902 }
 0x430   : > { %v908_v48 = vsel %vm675_vm3, %v903_v47, 0  ;;  %v1698_v47 = vld [vmem:[%s2173_s12 + $0x10] sm:$0xff]  }
 0x431   : > { %1576 = vmatpush3.bf16.msra.mxu0 %v908_v48  ;;  %v1699_v48 = vld [vmem:[%s2173_s12 + $0x8] sm:$0xff]  }
 0x432   : > { %1587 = vmatprep.subr.bf16.mxu0 %v1785_v5 }
 0x434   : > { %1578 = vmatmul.mubr.msk.bf16.vlgmr.msra.gmra.mxu0 %vm609_vm2, %v901_v50  ;;  %v1486_v50 = vld [vmem:[%s2172_s11] ss:$0 sm:$0xff] }
 0x435   : > { %1588 = vmatpush3.bf16.msra.mxu0 %v1026_v51  ;;  %1589 = vmatprep.mubr.msk.bf16.mxu0 %vm1786_vm1, %v1785_v5 }
 0x436   : > { %1601 = vmatprep.subr.bf16.mxu0 %v1785_v5 }
 0x439   : > { %v1718_v52 = vpop.eup %1717 }
 0x43a   : > { %v1018_v53 = vmul.f32 %v1718_v52, %v1710_v30 }
 0x43c   : > { %v1019_v54 = vpack.c.bf16 %v1018_v53, %v1018_v53 }
 0x43e   : > { %1590 = vmatmul.mubr.msk.bf16.vlgmr.msra.gmra.mxu0 %vm609_vm2, %v1019_v54 }
 0x43f   : > { %1605 = vmatprep.mubr.msk.bf16.mxu0 %vm1786_vm1, %v1785_v5  ;;  %1602 = vmatpush3.bf16.msra.mxu0 %v1691_v27 }
 0x440   : > { %1603 = vmatprep.subr.bf16.mxu0 %v1785_v5 }
 0x4c7   : > { %v713_v55 = vpop.f32.mrf.mxu0 }
 0x4c8   : > { %719 = vst.msk [vmem:[#allocation2] sm:$0xff] %vm609_vm2, %v713_v55 }
 0x4c9   : > { %v1555_v56 = vpop.f32.mrf.mxu0 }
 0x4cb   : > { %v716_v57 = vpop.f32.mrf.mxu0 }
 0x4cd   : > { %v1556_v58 = vpop.f32.mrf.mxu0 }
 0x4cf   : > { %v826_v59 = vpop.f32.mrf.mxu0 }
 0x4d0   : > { %833 = vrot.lane.b32.xlu1 %v826_v59, %s1799_s27 }
 0x4d1   : > { %v1567_v60 = vpop.f32.mrf.mxu0 }
 0x4d3   : > { %v829_v61 = vpop.f32.mrf.mxu0 }
 0x4d5   : > { %v1568_v62 = vpop.f32.mrf.mxu0 }
 0x4f4   : > { %v944_v1 = vpop.f32.mrf.mxu0 }
 0x4f5   : > { %951 = vrot.lane.b32.xlu0 %v944_v1, %s1800_s4  ;;  %s480_s4 = sand.u32 1, %s1775_s30  }
 0x4f6   : > { %v1579_v3 = vpop.f32.mrf.mxu0  ;;  %s1365_s17 = scalar_lea.sflag [#allocation4], %s480_s4 }
 0x4f8   : > { %v947_v4 = vpop.f32.mrf.mxu0 }
 0x4fa   : > { %v1580_v6 = vpop.f32.mrf.mxu0 }
 0x4fe   : > { %v1062_v7 = vpop.f32.mrf.mxu0 }
 0x4ff   : > { %1069 = vrot.lane.b32.xlu1 %v1062_v7, %s1801_s25  ;;  %s1462_s25 = sshll.u32 %s480_s4, 3 }
 0x500   : > { %v1591_v8 = vpop.f32.mrf.mxu0  ;;  %s482_s27 = scalar_lea.vmem [#allocation3], %s1462_s25 }
 0x501   : > { %s1378_s28 = sshll.u32 %s482_s27, 4  ;;  %s2121_s28 = int_to_ptr.vmem [resolvable:$true] %s1378_s28 }
 0x502   : > { %v1065_v9 = vpop.f32.mrf.mxu0  ;;  %s1723_s25 = scalar_lea.vmem %s2121_s28, 128  ;;  %p1730_p0 = scmp.lt.s32.totalorder %s2121_s28, %s1728_s20 }
 0x503   : > { %p1724_p11 = scmp.ne.s32.totalorder %s2121_s28, %s1723_s25  ;;  %p1731_p1 = scmp.lt.s32.totalorder %s1729_s21, %s1723_s25 }
 0x504   : > { %v1592_v10 = vpop.f32.mrf.mxu0 }
 0x505   : > { %p1725_p12 = pnand %p1724_p11, %p1916_p5  ;;  %p1732_p2 = por %p1731_p1, %p1730_p0 }
 0x507   : > { %p1726_p13 = pneg %p1725_p12 }
 0x509   : > { %p1733_p3 = pnand %p1732_p2, %p1726_p13 }
 0x542   : > { %v834_v11 = vpop.permute.xlu1 %833 }
 0x543   : > { %837 = vst.msk [vmem:[#allocation2] sm:$0xff] %vm836_vm4, %v834_v11 }
 0x567   : > { %v952_v12 = vpop.permute.xlu0 %951 }
 0x568   : > { %955 = vst.msk [vmem:[#allocation2] sm:$0xff] %vm954_vm5, %v952_v12 }
 0x571   : > { %v1070_v13 = vpop.permute.xlu1 %1069 }
 0x572   : > { %1073 = vst.msk [vmem:[#allocation2] sm:$0xff] %vm1072_vm6, %v1070_v13 }
 0x579   : > { %v1074_v14 = vld [vmem:[#allocation2] sm:$0xff] }
 0x57a   : > { %v1075_v15 = vpack.c.bf16 %v1074_v14, %v1074_v14 }
 0x57c   : > { %1598 = vmatmul.mubr.msk.bf16.vlgmr.msra.gmra.mxu1 %vm498_vm0, %v1075_v15 }
 0x57d   : > { %1625 = vmatprep.mubr.msk.bf16.mxu1 %vm1786_vm1, %v1785_v5  ;;  %1610 = vmatpush3.bf16.msra.mxu1 %v1693_v23 }
 0x57e   : > { %1611 = vmatprep.subr.bf16.mxu1 %v1785_v5 }
 0x581   : > { %1612 = vmatpush3.bf16.msra.mxu1 %v1694_v43 }
 0x582   : > { %1613 = vmatprep.subr.bf16.mxu1 %v1785_v5 }
 0x585   : > { %1614 = vmatpush3.bf16.msra.mxu1 %v1695_v44 }
 0x586   : > { %1615 = vmatprep.subr.bf16.mxu1 %v1785_v5 }
 0x589   : > { %1616 = vmatpush3.bf16.msra.mxu1 %v1696_v45 }
 0x58a   : > { %1617 = vmatprep.subr.bf16.mxu1 %v1785_v5 }
 0x58d   : > { %1618 = vmatpush3.bf16.msra.mxu1 %v1697_v46 }
 0x58e   : > { %1619 = vmatprep.subr.bf16.mxu1 %v1785_v5 }
 0x591   : > { %1620 = vmatpush3.bf16.msra.mxu1 %v1698_v47 }
 0x592   : > { %1621 = vmatprep.subr.bf16.mxu1 %v1785_v5 }
 0x595   : > { %1622 = vmatpush3.bf16.msra.mxu1 %v1699_v48 }
 0x596   : > { %1623 = vmatprep.subr.bf16.mxu1 %v1785_v5 }
 0x599   : > { %1624 = vmatpush3.bf16.msra.mxu1 %v1700_v49 }
 0x63c   : > { %v1136_v17 = vpop.f32.mrf.mxu1 }
 0x63d   : > { %v1137_v18 = vadd.f32 %v1480_v16, %v1136_v17 }
 0x63e   : > { %v1599_v19 = vpop.f32.mrf.mxu1 }
 0x63f   : > { %v2054_v20 = vadd.f32 %v1137_v18, %v1936_v0  ;;  %v1692_v0 = vld [vmem:[%s2171_s10] sm:$0xff]  }
 0x640   : > { %v1139_v21 = vpop.f32.mrf.mxu1  ;;  %1604 = vmatpush3.bf16.msra.mxu0 %v1692_v0 }
 0x641   : > { %v1145_v22 = vsel %vm498_vm0, %v2054_v20, 0.0  ;;  %v1149_v24 = vmul.f32 %v2054_v20, %v2054_v20 }
 0x642   : > { %1146 = vadd.xlane.f32.xlu0 %v1145_v22  ;;  %v1600_v25 = vpop.f32.mrf.mxu1 }
 0x643   : > { %v1150_v26 = vsel %vm498_vm0, %v1149_v24, 0.0 }
 0x644   : > { %1151 = vadd.xlane.f32.xlu1 %v1150_v26 }
 0x6cb   : > { %v1147_v28 = vpop.xlane.xlu0 %1146 }
 0x6cc   : > { %v1148_v29 = vmul.f32 0.03125, %v1147_v28 }
 0x6cd   : > { %v1152_v30 = vpop.xlane.xlu1 %1151 }
 0x6ce   : > { %v1154_v31 = vmul.f32 %v1148_v29, %v1148_v29  ;;  %v1153_v32 = vmul.f32 0.03125, %v1152_v30  ;;  %v1156_v35 = vsub.f32 %v2054_v20, %v1148_v29 }
 0x6d0   : > { %v1155_v33 = vsub.f32 %v1153_v32, %v1154_v31 }
 0x6d2   : > { %v1157_v34 = vadd.f32 1e-05, %v1155_v33 }
 0x6d4   : > { %1719 = vrsqrt.f32 %v1157_v34 }
 0x6e1   : > { %v1720_v36 = vpop.eup %1719 }
 0x6e2   : > { %v1159_v38 = vmul.f32 %v1720_v36, %v1156_v35 }
 0x6e4   : > { %v1166_v40 = vmul.f32 %v1484_v37, %v1159_v38 }
 0x6e6   : > { %v1173_v41 = vadd.f32 %v1485_v39, %v1166_v40 }
 0x6e8   : > { %v1174_v42 = vpack.c.bf16 %v1173_v41, %v1173_v41 }
 0x6ea   : > { %1606 = vmatmul.mubr.msk.bf16.vlgmr.msra.gmra.mxu0 %vm498_vm0, %v1174_v42 }
 0x7aa   : > { %v1235_v51 = vpop.f32.mrf.mxu0 }
 0x7ab   : > { %v1236_v52 = vadd.f32 %v1486_v50, %v1235_v51 }
 0x7ac   : > { %v1607_v53 = vpop.f32.mrf.mxu0 }
 0x7ad   : > { %v1241_v54 = vmul.f32 %v1236_v52, %v1236_v52 }
 0x7ae   : > { %v1238_v55 = vpop.f32.mrf.mxu0 }
 0x7af   : > { %v1242_v56 = vmul.f32 %v1241_v54, %v1236_v52 }
 0x7b0   : > { %v1608_v57 = vpop.f32.mrf.mxu0 }
 0x7b1   : > { %v1243_v58 = vmul.f32 0.044715, %v1242_v56 }
 0x7b3   : > { %v1244_v59 = vadd.f32 %v1243_v58, %v1236_v52 }
 0x7b5   : > { %v1245_v60 = vmul.f32 0.7978846, %v1244_v59 }
 0x7b7   : > { %1721 = vtanh.f32 %v1245_v60 }
 0x7c4   : > { %v1722_v61 = vpop.eup %1721 }
 0x7c5   : > { %v1247_v5 = vadd.f32 1.0, %v1722_v61 }
 0x7c7   : > { %v1248_v62 = vmul.f32 0.5, %v1247_v5 }
 0x7c9   : > { %v1249_v63 = vmul.f32 %v1248_v62, %v1236_v52 }
 0x7cb   : > { %v1250_v1 = vpack.c.bf16 %v1249_v63, %v1249_v63 }
 0x7cd   : > { %1626 = vmatmul.mubr.bf16.vlgmr.msra.gmra.mxu1 %v1250_v1 }
 0x88d   : > { %v1356_v3 = vpop.f32.mrf.mxu1 }
 0x88e   : > { %v1357_v4 = vadd.f32 %v1490_v2, %v1356_v3 }
 0x88f   : > { %v1627_v6 = vpop.f32.mrf.mxu1 }
 0x890   : > { %v1362_v7 = vadd.f32 %v1357_v4, %v2054_v20 }
 0x891   : > { %v1359_v8 = vpop.f32.mrf.mxu1 }
 0x892   : > { %1363 = vst.msk [vmem:[%s482_s27] sm:$0xff] %vm498_vm0, %v1362_v7 }
 0x893   : > { %v1628_v9 = vpop.f32.mrf.mxu1 }
 0x894   : > { %1736 = shalt.err (!%p1733_p3)
}
 0x895   : > { %s1737_s27 = scalar_lea.hbm %s2119_s3, 128  ;;  %s1741_s0 = scalar_lea.hbm %s2175_s14, 256 }
 0x896   : > { %p1738_p4 = scmp.ne.s32.totalorder %s2119_s3, %s1737_s27  ;;  %p1742_p9 = scmp.lt.s32.totalorder %s2119_s3, %s2175_s14 }
 0x897   : > { %p1743_p10 = scmp.lt.s32.totalorder %s1741_s0, %s1737_s27 }
 0x898   : > { %p1739_p7 = pnand %p1738_p4, %p1916_p5 }
 0x899   : > { %p1744_p11 = por %p1743_p10, %p1742_p9 }
 0x89a   : > { %p1740_p8 = pneg %p1739_p7 }
 0x89c   : > { %p1745_p12 = pnand %p1744_p11, %p1740_p8 }
 0x89e   : > { %1748 = shalt.err (!%p1745_p12)
}
 0x89f   : > { %1629 = dma.vmem_to_hbm [thread:$0]  (%p1916_p5), %s2121_s28, 128, %s2119_s3, %s1365_s17  }
 0x8a0 PF: > { %p1635_p13 = scmp.ge.s32.totalorder %s1783_s16, 2  ;;  %s1390_s25 = sand.u32 1, %s1771_s29  }
 0x8a1   : > { %s1391_s1 = scalar_lea.sflag [#allocation4], %s1390_s25 }
 0x8a2   : > { %p1632_p0 = pnand %p1635_p13, %p1920_p6 }
 0x8a4   : > { %p1633_p1 = pneg %p1632_p0 }
 0x8a6   : > { %1766 = dma.done.wait (%p1633_p1), %s1391_s1, 128  }
 0x8a7   : > { %1768 = vsyncadd (%p1633_p1), %s1391_s1, 4294967168  ;;  %p24_p2 = scmp.ge.s32.totalorder %s1903_s19, 4   ;;  %s2188_s29 = smov %s1775_s30 }
 0x8a8   : > { %s2189_s30 = smov %s1779_s15  ;;  %s2190_s15 = smov %s1914_s22 }
 0x8a9   : > { %s2191_s16 = smov %s1903_s19  ;;  %26 = sbr.rel (!%p24_p2) target bundleno = 8 (0x8), region = 117 }
 0x8ae   :  { %1396 = vsyncpa [#allocation4], 1 }
 0x8af   :  { %1398 = vsyncpa [#allocation4 + $0x1], 1 }

</bundles_post_ra>
